<compile_context>
chip_gen: v6e
topology: v6e:2x2x1
jax: 0.10.0
libtpu: 0.0.40
codegen_flags: <defaults>
</compile_context>

<pallas_src>
import functools

import jax
import jax.numpy as jnp
from jax.experimental import pallas as pl
from jax.experimental.pallas import tpu as pltpu

# ---- module hyper-parameters (small but faithful to the reference MLP) ----
NB_LAYERS = 8                 # default in EPIField
SKIP = NB_LAYERS // 2         # skip layer index (= 4)
HID = 32                      # hid_dims (reference default 256, shrunk)
EMB = 16                      # emb_dims
EPI = 16                      # epi_emb_dims
UV_DIM = 16                   # raw uv_embeds feature size
COLOR_UV = 12                 # color_uv_dims (first 12 uv features used)

# ---- packed ray-slab layout (one lane-dense input stream) ----
E_OFF = 0                     # all_embeds = [st | epi]
E_DIM = EMB + EPI             # 32
UV_OFF = E_OFF + E_DIM        # 32
DIST_COL = UV_OFF + UV_DIM    # 48
SLAB_DIM = 64                 # padded to a nice lane width

N_RAYS = 256
TM = 128                      # rays per grid step (grid=2 -> both v7x TCs)


def epi_field_kernel(rays_ref, w_slab_ref, w_hid_ref, b_hid_ref,
                     w_out_ref, b_out_ref, out_ref):
    """One ray tile (TM rays) through the whole EPIField MLP.

    rays_ref : (TM, SLAB_DIM) f32   packed [st|epi | uv | dist | pad]
    w_slab   : (3, SLAB_DIM, HID) bf16  slab-consuming weights
               [0]=fc0(all_embeds), [1]=fc4 embed part, [2]=color_fc uv part
    w_hid    : (8, HID, HID) bf16   [fc1,fc2,fc3, fc4_x, fc5,fc6,fc7, color_fc_x]
    b_hid    : (9, 1, HID) f32      [b_fc0..b_fc7, b_color_fc]
    w_out    : (2, HID, 4) bf16     [alpha head in col 0 | color head in cols 1:4]
    b_out    : (2, 1, 4) f32
    out_ref  : (TM, 4) f32          col 0 = alpha, cols 1:4 = color
    """
    relu = lambda v: jnp.maximum(v, 0.0)
    bf16 = jnp.bfloat16
    f32 = jnp.float32

    rays = rays_ref[...]                      # (TM, 64) f32
    slab = rays.astype(bf16)                  # matmul operand
    dist = rays[:, DIST_COL:DIST_COL + 1]     # (TM, 1) f32

    # fc0: Linear(emb+epi -> hid) on all_embeds (unused slab cols hit 0 rows)
    x = relu(jnp.dot(slab, w_slab_ref[0], preferred_element_type=f32)
             + b_hid_ref[0])

    # fc1..fc3: Linear(hid -> hid)
    for i in range(1, SKIP):
        x = relu(jnp.dot(x.astype(bf16), w_hid_ref[i - 1],
                         preferred_element_type=f32) + b_hid_ref[i])

    # fc4 (skip): Linear(hid+emb+epi -> hid) on cat([x, all_embeds]) as split matmuls
    x = relu(jnp.dot(x.astype(bf16), w_hid_ref[SKIP - 1],
                     preferred_element_type=f32)
             + jnp.dot(slab, w_slab_ref[1], preferred_element_type=f32)
             + b_hid_ref[SKIP])

    # fc5..fc7: Linear(hid -> hid)
    for i in range(SKIP + 1, NB_LAYERS):
        x = relu(jnp.dot(x.astype(bf16), w_hid_ref[i - 1],
                         preferred_element_type=f32) + b_hid_ref[i])

    xb = x.astype(bf16)

    # alpha head (packed into column 0 of a 4-lane tile)
    a4 = jnp.dot(xb, w_out_ref[0], preferred_element_type=f32) + b_out_ref[0]
    # TODO(synk): training-mode `pred_alpha += randn_like(pred_alpha)` omitted
    # (eval semantics); could be added with pltpu.prng_* if needed.
    alpha4 = 1.0 - jnp.exp(-relu(a4) * dist)          # cols 1:4 are dummies

    # color head: cat([x, uv[..., :12]]) -> Linear -> relu -> Linear -> sigmoid*
    h = relu(jnp.dot(xb, w_hid_ref[NB_LAYERS - 1], preferred_element_type=f32)
             + jnp.dot(slab, w_slab_ref[2], preferred_element_type=f32)
             + b_hid_ref[NB_LAYERS])
    c4 = jnp.dot(h.astype(bf16), w_out_ref[1],
                 preferred_element_type=f32) + b_out_ref[1]
    color4 = jax.nn.sigmoid(c4) * (1.0 + 2.0 * 0.001) - 0.001  # col 0 is dummy

    lane = jax.lax.broadcasted_iota(jnp.int32, (TM, 4), 1)
    out_ref[...] = jnp.where(lane == 0, alpha4, color4).astype(out_ref.dtype)


# --------------------------------------------------------------------------
# Parameter construction
# --------------------------------------------------------------------------
def init_module_params(key):
    """Per-layer f32 params mirroring the PyTorch module (weights as (in,out))."""
    def linear(k, fan_in, fan_out):
        kw, kb = jax.random.split(k)
        bound = 1.0 / jnp.sqrt(jnp.float32(fan_in))
        w = jax.random.uniform(kw, (fan_in, fan_out), jnp.float32, -bound, bound)
        b = jax.random.uniform(kb, (1, fan_out), jnp.float32, -bound, bound)
        return w, b

    keys = jax.random.split(key, NB_LAYERS + 3)
    p = {'fc0': linear(keys[0], EMB + EPI, HID)}
    for i in range(1, NB_LAYERS):
        fan_in = HID + EMB + EPI if i == SKIP else HID
        p[f'fc{i}'] = linear(keys[i], fan_in, HID)
    p['alpha_out'] = linear(keys[NB_LAYERS], HID, 1)
    p['color_fc'] = linear(keys[NB_LAYERS + 1], HID + COLOR_UV, HID)
    p['color_out'] = linear(keys[NB_LAYERS + 2], HID, 3)
    return p


def pack_kernel_params(p):
    """Consolidate the module params into 5 stacked kernel arrays."""
    f32, bf16 = jnp.float32, jnp.bfloat16

    w0, b0 = p['fc0']                       # (32, 32)
    w4, b4 = p[f'fc{SKIP}']                 # (64, 32) = [x | all_embeds]
    wcf, bcf = p['color_fc']                # (44, 32) = [x | uv[:12]]
    wa, ba = p['alpha_out']                 # (32, 1)
    wo, bo = p['color_out']                 # (32, 3)

    # slab-consuming weights: zero rows for unused slab columns
    w_slab = jnp.zeros((3, SLAB_DIM, HID), f32)
    w_slab = w_slab.at[0, E_OFF:E_OFF + E_DIM].set(w0)
    w_slab = w_slab.at[1, E_OFF:E_OFF + E_DIM].set(w4[HID:])
    w_slab = w_slab.at[2, UV_OFF:UV_OFF + COLOR_UV].set(wcf[HID:])

    # hidden (HID->HID) weights: fc1..fc3, fc4 x-part, fc5..fc7, color_fc x-part
    hid_ws = []
    for i in range(1, NB_LAYERS):
        wi, _ = p[f'fc{i}']
        hid_ws.append(wi[:HID] if i == SKIP else wi)
    hid_ws.append(wcf[:HID])
    w_hid = jnp.stack(hid_ws, axis=0)       # (8, 32, 32)

    # trunk biases: fc0..fc7, color_fc
    b_hid = jnp.stack([p[f'fc{i}'][1] for i in range(NB_LAYERS)] + [bcf],
                      axis=0)               # (9, 1, 32)

    # output heads packed on 4 lanes: col0 = alpha, cols1:4 = color
    w_out = jnp.zeros((2, HID, 4), f32)
    w_out = w_out.at[0, :, 0:1].set(wa)
    w_out = w_out.at[1, :, 1:4].set(wo)
    b_out = jnp.zeros((2, 1, 4), f32)
    b_out = b_out.at[0, :, 0:1].set(ba)
    b_out = b_out.at[1, :, 1:4].set(bo)

    return (w_slab.astype(bf16), w_hid.astype(bf16), b_hid,
            w_out.astype(bf16), b_out)


# --------------------------------------------------------------------------
# Wrapper
# --------------------------------------------------------------------------
@jax.jit
def epi_field_forward(uv_embeds, st_embeds, epi_embeds, dist, kernel_params):
    w_slab, w_hid, b_hid, w_out, b_out = kernel_params
    n = uv_embeds.shape[0]
    n_pad = pl.cdiv(n, TM) * TM

    # pack all ray data into one lane-dense slab: [st|epi | uv | dist | pad]
    pad_cols = SLAB_DIM - (E_DIM + UV_DIM + 1)
    slab = jnp.concatenate(
        [st_embeds, epi_embeds, uv_embeds, dist,
         jnp.zeros((n, pad_cols), jnp.float32)], axis=-1)
    if n_pad != n:
        slab = jnp.pad(slab, ((0, n_pad - n), (0, 0)))

    grid = (n_pad // TM,)

    def full_spec(a):
        nd = a.ndim
        return pl.BlockSpec(a.shape, lambda i, _nd=nd: (0,) * _nd)

    in_specs = [pl.BlockSpec((TM, SLAB_DIM), lambda i: (i, 0))]
    in_specs += [full_spec(a) for a in (w_slab, w_hid, b_hid, w_out, b_out)]

    out = pl.pallas_call(
        epi_field_kernel,
        out_shape=jax.ShapeDtypeStruct((n_pad, 4), jnp.float32),
        grid_spec=pltpu.PrefetchScalarGridSpec(
            num_scalar_prefetch=0,
            grid=grid,
            in_specs=in_specs,
            out_specs=pl.BlockSpec((TM, 4), lambda i: (i, 0)),
        ),
        compiler_params=pltpu.CompilerParams(
            dimension_semantics=("parallel",)),
    )(slab, w_slab, w_hid, b_hid, w_out, b_out)

    alpha = out[:n, 0:1]
    color = out[:n, 1:4]
    return alpha, color


# --------------------------------------------------------------------------
# Plain-JAX reference (mirrors the PyTorch forward in eval mode; matmuls use
# the same bf16-operand / f32-accumulate precision as the kernel)
# --------------------------------------------------------------------------
def epi_field_reference(uv_embeds, st_embeds, epi_embeds, dist, p):
    bf16, f32 = jnp.bfloat16, jnp.float32

    def mm(a, w):
        return jnp.dot(a.astype(bf16), w.astype(bf16),
                       preferred_element_type=f32)

    relu = lambda v: jnp.maximum(v, 0.0)
    all_embeds = jnp.concatenate([st_embeds, epi_embeds], axis=-1)

    w0, b0 = p['fc0']
    x = relu(mm(all_embeds, w0) + b0)
    for i in range(1, NB_LAYERS):
        w, b = p[f'fc{i}']
        if i == SKIP:
            x = relu(mm(x, w[:HID]) + mm(all_embeds, w[HID:]) + b)
        else:
            x = relu(mm(x, w) + b)

    wa, ba = p['alpha_out']
    pred_alpha = mm(x, wa) + ba
    alpha = 1.0 - jnp.exp(-relu(pred_alpha) * dist)

    wc, bc = p['color_fc']
    h = relu(mm(x, wc[:HID]) + mm(uv_embeds[..., :COLOR_UV], wc[HID:]) + bc)
    wo, bo = p['color_out']
    color = mm(h, wo) + bo
    color = jax.nn.sigmoid(color) * (1.0 + 2.0 * 0.001) - 0.001
    return alpha, color


if __name__ == "__main__":
    key = jax.random.PRNGKey(0)
    k_uv, k_st, k_epi, k_dist, k_par = jax.random.split(key, 5)

    uv_embeds = jax.random.normal(k_uv, (N_RAYS, UV_DIM), jnp.float32)
    st_embeds = jax.random.normal(k_st, (N_RAYS, EMB), jnp.float32)
    epi_embeds = jax.random.normal(k_epi, (N_RAYS, EPI), jnp.float32)
    dist = jax.random.uniform(k_dist, (N_RAYS, 1), jnp.float32, 0.01, 1.0)

    module_params = init_module_params(k_par)
    kernel_params = pack_kernel_params(module_params)

    alpha, color = epi_field_forward(uv_embeds, st_embeds, epi_embeds, dist,
                                     kernel_params)
    jax.block_until_ready((alpha, color))

    alpha_ref, color_ref = epi_field_reference(uv_embeds, st_embeds,
                                               epi_embeds, dist, module_params)

    assert alpha.shape == (N_RAYS, 1) and color.shape == (N_RAYS, 3)
    assert jnp.allclose(alpha, alpha_ref, atol=2e-3, rtol=2e-3), (
        float(jnp.max(jnp.abs(alpha - alpha_ref))))
    assert jnp.allclose(color, color_ref, atol=2e-3, rtol=2e-3), (
        float(jnp.max(jnp.abs(color - color_ref))))

    print("KERNEL_OK")
</pallas_src>

<mosaic_0001>
module attributes {stable_mosaic.version = 11 : i64} {
  func.func @epi_field_kernel(%arg0: i32, %arg1: memref<128x64xf32, #tpu.memory_space<vmem>>, %arg2: memref<3x64x32xbf16, #tpu.memory_space<vmem>>, %arg3: memref<8x32x32xbf16, #tpu.memory_space<vmem>>, %arg4: memref<9x1x32xf32, #tpu.memory_space<vmem>>, %arg5: memref<2x32x4xbf16, #tpu.memory_space<vmem>>, %arg6: memref<2x1x4xf32, #tpu.memory_space<vmem>>, %arg7: memref<128x4xf32, #tpu.memory_space<vmem>>) attributes {dimension_semantics = [#tpu.dimension_semantics<parallel>], iteration_bounds = array<i64: 2>, scalar_prefetch = 0 : i64, scratch_operands = 0 : i64, tpu.core_type = #tpu.core_type<tc>, window_params = [{transform_indices = @transform_0, window_bounds = array<i64: 128, 64>}, {pipeline_mode = #tpu.pipeline_mode<synchronous>, transform_indices = @transform_1, window_bounds = array<i64: 3, 64, 32>}, {pipeline_mode = #tpu.pipeline_mode<synchronous>, transform_indices = @transform_2, window_bounds = array<i64: 8, 32, 32>}, {pipeline_mode = #tpu.pipeline_mode<synchronous>, transform_indices = @transform_3, window_bounds = array<i64: 9, 1, 32>}, {pipeline_mode = #tpu.pipeline_mode<synchronous>, transform_indices = @transform_4, window_bounds = array<i64: 2, 32, 4>}, {pipeline_mode = #tpu.pipeline_mode<synchronous>, transform_indices = @transform_5, window_bounds = array<i64: 2, 1, 4>}, {transform_indices = @transform_6, window_bounds = array<i64: 128, 4>}]} {
    %c0 = arith.constant 0 : index
    %c0_0 = arith.constant 0 : index
    %0 = vector.load %arg1[%c0, %c0_0] : memref<128x64xf32, #tpu.memory_space<vmem>>, vector<128x64xf32>
    %1 = arith.truncf %0 : vector<128x64xf32> to vector<128x64xbf16>
    %2 = vector.extract_strided_slice %0 {offsets = [0, 48], sizes = [128, 1], strides = [1, 1]} : vector<128x64xf32> to vector<128x1xf32>
    %c0_1 = arith.constant 0 : index
    %c0_2 = arith.constant 0 : index
    %c0_3 = arith.constant 0 : index
    %3 = vector.load %arg2[%c0_1, %c0_2, %c0_3] : memref<3x64x32xbf16, #tpu.memory_space<vmem>>, vector<1x64x32xbf16>
    %4 = vector.shape_cast %3 : vector<1x64x32xbf16> to vector<64x32xbf16>
    %cst = arith.constant dense<0.000000e+00> : vector<128x32xf32>
    %5 = tpu.matmul %1, %4, %cst {dimension_numbers = #tpu.dot_dimension_numbers<[1], [0], [0], [1], [0, 0, 1, 1], [], []>} : vector<128x64xbf16>, vector<64x32xbf16>, vector<128x32xf32> -> vector<128x32xf32>
    %c0_4 = arith.constant 0 : index
    %c0_5 = arith.constant 0 : index
    %c0_6 = arith.constant 0 : index
    %6 = vector.load %arg4[%c0_4, %c0_5, %c0_6] : memref<9x1x32xf32, #tpu.memory_space<vmem>>, vector<1x1x32xf32>
    %7 = vector.shape_cast %6 : vector<1x1x32xf32> to vector<1x32xf32>
    %8 = vector.broadcast %7 : vector<1x32xf32> to vector<128x32xf32>
    %9 = arith.addf %5, %8 : vector<128x32xf32>
    %cst_7 = arith.constant 0.000000e+00 : f32
    %10 = vector.broadcast %cst_7 : f32 to vector<128x32xf32>
    %11 = arith.maximumf %9, %10 : vector<128x32xf32>
    %12 = arith.truncf %11 : vector<128x32xf32> to vector<128x32xbf16>
    %c0_8 = arith.constant 0 : index
    %c0_9 = arith.constant 0 : index
    %c0_10 = arith.constant 0 : index
    %13 = vector.load %arg3[%c0_8, %c0_9, %c0_10] : memref<8x32x32xbf16, #tpu.memory_space<vmem>>, vector<1x32x32xbf16>
    %14 = vector.shape_cast %13 : vector<1x32x32xbf16> to vector<32x32xbf16>
    %cst_11 = arith.constant dense<0.000000e+00> : vector<128x32xf32>
    %15 = tpu.matmul %12, %14, %cst_11 {dimension_numbers = #tpu.dot_dimension_numbers<[1], [0], [0], [1], [0, 0, 1, 1], [], []>} : vector<128x32xbf16>, vector<32x32xbf16>, vector<128x32xf32> -> vector<128x32xf32>
    %c1 = arith.constant 1 : index
    %c0_12 = arith.constant 0 : index
    %c0_13 = arith.constant 0 : index
    %16 = vector.load %arg4[%c1, %c0_12, %c0_13] : memref<9x1x32xf32, #tpu.memory_space<vmem>>, vector<1x1x32xf32>
    %17 = vector.shape_cast %16 : vector<1x1x32xf32> to vector<1x32xf32>
    %18 = vector.broadcast %17 : vector<1x32xf32> to vector<128x32xf32>
    %19 = arith.addf %15, %18 : vector<128x32xf32>
    %cst_14 = arith.constant 0.000000e+00 : f32
    %20 = vector.broadcast %cst_14 : f32 to vector<128x32xf32>
    %21 = arith.maximumf %19, %20 : vector<128x32xf32>
    %22 = arith.truncf %21 : vector<128x32xf32> to vector<128x32xbf16>
    %c1_15 = arith.constant 1 : index
    %c0_16 = arith.constant 0 : index
    %c0_17 = arith.constant 0 : index
    %23 = vector.load %arg3[%c1_15, %c0_16, %c0_17] : memref<8x32x32xbf16, #tpu.memory_space<vmem>>, vector<1x32x32xbf16>
    %24 = vector.shape_cast %23 : vector<1x32x32xbf16> to vector<32x32xbf16>
    %cst_18 = arith.constant dense<0.000000e+00> : vector<128x32xf32>
    %25 = tpu.matmul %22, %24, %cst_18 {dimension_numbers = #tpu.dot_dimension_numbers<[1], [0], [0], [1], [0, 0, 1, 1], [], []>} : vector<128x32xbf16>, vector<32x32xbf16>, vector<128x32xf32> -> vector<128x32xf32>
    %c2 = arith.constant 2 : index
    %c0_19 = arith.constant 0 : index
    %c0_20 = arith.constant 0 : index
    %26 = vector.load %arg4[%c2, %c0_19, %c0_20] : memref<9x1x32xf32, #tpu.memory_space<vmem>>, vector<1x1x32xf32>
    %27 = vector.shape_cast %26 : vector<1x1x32xf32> to vector<1x32xf32>
    %28 = vector.broadcast %27 : vector<1x32xf32> to vector<128x32xf32>
    %29 = arith.addf %25, %28 : vector<128x32xf32>
    %cst_21 = arith.constant 0.000000e+00 : f32
    %30 = vector.broadcast %cst_21 : f32 to vector<128x32xf32>
    %31 = arith.maximumf %29, %30 : vector<128x32xf32>
    %32 = arith.truncf %31 : vector<128x32xf32> to vector<128x32xbf16>
    %c2_22 = arith.constant 2 : index
    %c0_23 = arith.constant 0 : index
    %c0_24 = arith.constant 0 : index
    %33 = vector.load %arg3[%c2_22, %c0_23, %c0_24] : memref<8x32x32xbf16, #tpu.memory_space<vmem>>, vector<1x32x32xbf16>
    %34 = vector.shape_cast %33 : vector<1x32x32xbf16> to vector<32x32xbf16>
    %cst_25 = arith.constant dense<0.000000e+00> : vector<128x32xf32>
    %35 = tpu.matmul %32, %34, %cst_25 {dimension_numbers = #tpu.dot_dimension_numbers<[1], [0], [0], [1], [0, 0, 1, 1], [], []>} : vector<128x32xbf16>, vector<32x32xbf16>, vector<128x32xf32> -> vector<128x32xf32>
    %c3 = arith.constant 3 : index
    %c0_26 = arith.constant 0 : index
    %c0_27 = arith.constant 0 : index
    %36 = vector.load %arg4[%c3, %c0_26, %c0_27] : memref<9x1x32xf32, #tpu.memory_space<vmem>>, vector<1x1x32xf32>
    %37 = vector.shape_cast %36 : vector<1x1x32xf32> to vector<1x32xf32>
    %38 = vector.broadcast %37 : vector<1x32xf32> to vector<128x32xf32>
    %39 = arith.addf %35, %38 : vector<128x32xf32>
    %cst_28 = arith.constant 0.000000e+00 : f32
    %40 = vector.broadcast %cst_28 : f32 to vector<128x32xf32>
    %41 = arith.maximumf %39, %40 : vector<128x32xf32>
    %42 = arith.truncf %41 : vector<128x32xf32> to vector<128x32xbf16>
    %c3_29 = arith.constant 3 : index
    %c0_30 = arith.constant 0 : index
    %c0_31 = arith.constant 0 : index
    %43 = vector.load %arg3[%c3_29, %c0_30, %c0_31] : memref<8x32x32xbf16, #tpu.memory_space<vmem>>, vector<1x32x32xbf16>
    %44 = vector.shape_cast %43 : vector<1x32x32xbf16> to vector<32x32xbf16>
    %cst_32 = arith.constant dense<0.000000e+00> : vector<128x32xf32>
    %45 = tpu.matmul %42, %44, %cst_32 {dimension_numbers = #tpu.dot_dimension_numbers<[1], [0], [0], [1], [0, 0, 1, 1], [], []>} : vector<128x32xbf16>, vector<32x32xbf16>, vector<128x32xf32> -> vector<128x32xf32>
    %c1_33 = arith.constant 1 : index
    %c0_34 = arith.constant 0 : index
    %c0_35 = arith.constant 0 : index
    %46 = vector.load %arg2[%c1_33, %c0_34, %c0_35] : memref<3x64x32xbf16, #tpu.memory_space<vmem>>, vector<1x64x32xbf16>
    %47 = vector.shape_cast %46 : vector<1x64x32xbf16> to vector<64x32xbf16>
    %cst_36 = arith.constant dense<0.000000e+00> : vector<128x32xf32>
    %48 = tpu.matmul %1, %47, %cst_36 {dimension_numbers = #tpu.dot_dimension_numbers<[1], [0], [0], [1], [0, 0, 1, 1], [], []>} : vector<128x64xbf16>, vector<64x32xbf16>, vector<128x32xf32> -> vector<128x32xf32>
    %49 = arith.addf %45, %48 : vector<128x32xf32>
    %c4 = arith.constant 4 : index
    %c0_37 = arith.constant 0 : index
    %c0_38 = arith.constant 0 : index
    %50 = vector.load %arg4[%c4, %c0_37, %c0_38] : memref<9x1x32xf32, #tpu.memory_space<vmem>>, vector<1x1x32xf32>
    %51 = vector.shape_cast %50 : vector<1x1x32xf32> to vector<1x32xf32>
    %52 = vector.broadcast %51 : vector<1x32xf32> to vector<128x32xf32>
    %53 = arith.addf %49, %52 : vector<128x32xf32>
    %cst_39 = arith.constant 0.000000e+00 : f32
    %54 = vector.broadcast %cst_39 : f32 to vector<128x32xf32>
    %55 = arith.maximumf %53, %54 : vector<128x32xf32>
    %56 = arith.truncf %55 : vector<128x32xf32> to vector<128x32xbf16>
    %c4_40 = arith.constant 4 : index
    %c0_41 = arith.constant 0 : index
    %c0_42 = arith.constant 0 : index
    %57 = vector.load %arg3[%c4_40, %c0_41, %c0_42] : memref<8x32x32xbf16, #tpu.memory_space<vmem>>, vector<1x32x32xbf16>
    %58 = vector.shape_cast %57 : vector<1x32x32xbf16> to vector<32x32xbf16>
    %cst_43 = arith.constant dense<0.000000e+00> : vector<128x32xf32>
    %59 = tpu.matmul %56, %58, %cst_43 {dimension_numbers = #tpu.dot_dimension_numbers<[1], [0], [0], [1], [0, 0, 1, 1], [], []>} : vector<128x32xbf16>, vector<32x32xbf16>, vector<128x32xf32> -> vector<128x32xf32>
    %c5 = arith.constant 5 : index
    %c0_44 = arith.constant 0 : index
    %c0_45 = arith.constant 0 : index
    %60 = vector.load %arg4[%c5, %c0_44, %c0_45] : memref<9x1x32xf32, #tpu.memory_space<vmem>>, vector<1x1x32xf32>
    %61 = vector.shape_cast %60 : vector<1x1x32xf32> to vector<1x32xf32>
    %62 = vector.broadcast %61 : vector<1x32xf32> to vector<128x32xf32>
    %63 = arith.addf %59, %62 : vector<128x32xf32>
    %cst_46 = arith.constant 0.000000e+00 : f32
    %64 = vector.broadcast %cst_46 : f32 to vector<128x32xf32>
    %65 = arith.maximumf %63, %64 : vector<128x32xf32>
    %66 = arith.truncf %65 : vector<128x32xf32> to vector<128x32xbf16>
    %c5_47 = arith.constant 5 : index
    %c0_48 = arith.constant 0 : index
    %c0_49 = arith.constant 0 : index
    %67 = vector.load %arg3[%c5_47, %c0_48, %c0_49] : memref<8x32x32xbf16, #tpu.memory_space<vmem>>, vector<1x32x32xbf16>
    %68 = vector.shape_cast %67 : vector<1x32x32xbf16> to vector<32x32xbf16>
    %cst_50 = arith.constant dense<0.000000e+00> : vector<128x32xf32>
    %69 = tpu.matmul %66, %68, %cst_50 {dimension_numbers = #tpu.dot_dimension_numbers<[1], [0], [0], [1], [0, 0, 1, 1], [], []>} : vector<128x32xbf16>, vector<32x32xbf16>, vector<128x32xf32> -> vector<128x32xf32>
    %c6 = arith.constant 6 : index
    %c0_51 = arith.constant 0 : index
    %c0_52 = arith.constant 0 : index
    %70 = vector.load %arg4[%c6, %c0_51, %c0_52] : memref<9x1x32xf32, #tpu.memory_space<vmem>>, vector<1x1x32xf32>
    %71 = vector.shape_cast %70 : vector<1x1x32xf32> to vector<1x32xf32>
    %72 = vector.broadcast %71 : vector<1x32xf32> to vector<128x32xf32>
    %73 = arith.addf %69, %72 : vector<128x32xf32>
    %cst_53 = arith.constant 0.000000e+00 : f32
    %74 = vector.broadcast %cst_53 : f32 to vector<128x32xf32>
    %75 = arith.maximumf %73, %74 : vector<128x32xf32>
    %76 = arith.truncf %75 : vector<128x32xf32> to vector<128x32xbf16>
    %c6_54 = arith.constant 6 : index
    %c0_55 = arith.constant 0 : index
    %c0_56 = arith.constant 0 : index
    %77 = vector.load %arg3[%c6_54, %c0_55, %c0_56] : memref<8x32x32xbf16, #tpu.memory_space<vmem>>, vector<1x32x32xbf16>
    %78 = vector.shape_cast %77 : vector<1x32x32xbf16> to vector<32x32xbf16>
    %cst_57 = arith.constant dense<0.000000e+00> : vector<128x32xf32>
    %79 = tpu.matmul %76, %78, %cst_57 {dimension_numbers = #tpu.dot_dimension_numbers<[1], [0], [0], [1], [0, 0, 1, 1], [], []>} : vector<128x32xbf16>, vector<32x32xbf16>, vector<128x32xf32> -> vector<128x32xf32>
    %c7 = arith.constant 7 : index
    %c0_58 = arith.constant 0 : index
    %c0_59 = arith.constant 0 : index
    %80 = vector.load %arg4[%c7, %c0_58, %c0_59] : memref<9x1x32xf32, #tpu.memory_space<vmem>>, vector<1x1x32xf32>
    %81 = vector.shape_cast %80 : vector<1x1x32xf32> to vector<1x32xf32>
    %82 = vector.broadcast %81 : vector<1x32xf32> to vector<128x32xf32>
    %83 = arith.addf %79, %82 : vector<128x32xf32>
    %cst_60 = arith.constant 0.000000e+00 : f32
    %84 = vector.broadcast %cst_60 : f32 to vector<128x32xf32>
    %85 = arith.maximumf %83, %84 : vector<128x32xf32>
    %86 = arith.truncf %85 : vector<128x32xf32> to vector<128x32xbf16>
    %c0_61 = arith.constant 0 : index
    %c0_62 = arith.constant 0 : index
    %c0_63 = arith.constant 0 : index
    %87 = vector.load %arg5[%c0_61, %c0_62, %c0_63] : memref<2x32x4xbf16, #tpu.memory_space<vmem>>, vector<1x32x4xbf16>
    %88 = vector.shape_cast %87 : vector<1x32x4xbf16> to vector<32x4xbf16>
    %cst_64 = arith.constant dense<0.000000e+00> : vector<128x4xf32>
    %89 = tpu.matmul %86, %88, %cst_64 {dimension_numbers = #tpu.dot_dimension_numbers<[1], [0], [0], [1], [0, 0, 1, 1], [], []>} : vector<128x32xbf16>, vector<32x4xbf16>, vector<128x4xf32> -> vector<128x4xf32>
    %c0_65 = arith.constant 0 : index
    %c0_66 = arith.constant 0 : index
    %c0_67 = arith.constant 0 : index
    %90 = vector.load %arg6[%c0_65, %c0_66, %c0_67] : memref<2x1x4xf32, #tpu.memory_space<vmem>>, vector<1x1x4xf32>
    %91 = vector.shape_cast %90 : vector<1x1x4xf32> to vector<1x4xf32>
    %92 = vector.broadcast %91 : vector<1x4xf32> to vector<128x4xf32>
    %93 = arith.addf %89, %92 : vector<128x4xf32>
    %cst_68 = arith.constant 0.000000e+00 : f32
    %94 = vector.broadcast %cst_68 : f32 to vector<128x4xf32>
    %95 = arith.maximumf %93, %94 : vector<128x4xf32>
    %cst_69 = arith.constant 0.000000e+00 : f32
    %96 = vector.broadcast %cst_69 : f32 to vector<128x4xf32>
    %97 = arith.subf %96, %95 : vector<128x4xf32>
    %98 = vector.broadcast %2 : vector<128x1xf32> to vector<128x4xf32>
    %99 = arith.mulf %97, %98 : vector<128x4xf32>
    %100 = math.exp %99 : vector<128x4xf32>
    %cst_70 = arith.constant 1.000000e+00 : f32
    %101 = vector.broadcast %cst_70 : f32 to vector<128x4xf32>
    %102 = arith.subf %101, %100 : vector<128x4xf32>
    %c7_71 = arith.constant 7 : index
    %c0_72 = arith.constant 0 : index
    %c0_73 = arith.constant 0 : index
    %103 = vector.load %arg3[%c7_71, %c0_72, %c0_73] : memref<8x32x32xbf16, #tpu.memory_space<vmem>>, vector<1x32x32xbf16>
    %104 = vector.shape_cast %103 : vector<1x32x32xbf16> to vector<32x32xbf16>
    %cst_74 = arith.constant dense<0.000000e+00> : vector<128x32xf32>
    %105 = tpu.matmul %86, %104, %cst_74 {dimension_numbers = #tpu.dot_dimension_numbers<[1], [0], [0], [1], [0, 0, 1, 1], [], []>} : vector<128x32xbf16>, vector<32x32xbf16>, vector<128x32xf32> -> vector<128x32xf32>
    %c2_75 = arith.constant 2 : index
    %c0_76 = arith.constant 0 : index
    %c0_77 = arith.constant 0 : index
    %106 = vector.load %arg2[%c2_75, %c0_76, %c0_77] : memref<3x64x32xbf16, #tpu.memory_space<vmem>>, vector<1x64x32xbf16>
    %107 = vector.shape_cast %106 : vector<1x64x32xbf16> to vector<64x32xbf16>
    %cst_78 = arith.constant dense<0.000000e+00> : vector<128x32xf32>
    %108 = tpu.matmul %1, %107, %cst_78 {dimension_numbers = #tpu.dot_dimension_numbers<[1], [0], [0], [1], [0, 0, 1, 1], [], []>} : vector<128x64xbf16>, vector<64x32xbf16>, vector<128x32xf32> -> vector<128x32xf32>
    %109 = arith.addf %105, %108 : vector<128x32xf32>
    %c8 = arith.constant 8 : index
    %c0_79 = arith.constant 0 : index
    %c0_80 = arith.constant 0 : index
    %110 = vector.load %arg4[%c8, %c0_79, %c0_80] : memref<9x1x32xf32, #tpu.memory_space<vmem>>, vector<1x1x32xf32>
    %111 = vector.shape_cast %110 : vector<1x1x32xf32> to vector<1x32xf32>
    %112 = vector.broadcast %111 : vector<1x32xf32> to vector<128x32xf32>
    %113 = arith.addf %109, %112 : vector<128x32xf32>
    %cst_81 = arith.constant 0.000000e+00 : f32
    %114 = vector.broadcast %cst_81 : f32 to vector<128x32xf32>
    %115 = arith.maximumf %113, %114 : vector<128x32xf32>
    %116 = arith.truncf %115 : vector<128x32xf32> to vector<128x32xbf16>
    %c1_82 = arith.constant 1 : index
    %c0_83 = arith.constant 0 : index
    %c0_84 = arith.constant 0 : index
    %117 = vector.load %arg5[%c1_82, %c0_83, %c0_84] : memref<2x32x4xbf16, #tpu.memory_space<vmem>>, vector<1x32x4xbf16>
    %118 = vector.shape_cast %117 : vector<1x32x4xbf16> to vector<32x4xbf16>
    %cst_85 = arith.constant dense<0.000000e+00> : vector<128x4xf32>
    %119 = tpu.matmul %116, %118, %cst_85 {dimension_numbers = #tpu.dot_dimension_numbers<[1], [0], [0], [1], [0, 0, 1, 1], [], []>} : vector<128x32xbf16>, vector<32x4xbf16>, vector<128x4xf32> -> vector<128x4xf32>
    %c1_86 = arith.constant 1 : index
    %c0_87 = arith.constant 0 : index
    %c0_88 = arith.constant 0 : index
    %120 = vector.load %arg6[%c1_86, %c0_87, %c0_88] : memref<2x1x4xf32, #tpu.memory_space<vmem>>, vector<1x1x4xf32>
    %121 = vector.shape_cast %120 : vector<1x1x4xf32> to vector<1x4xf32>
    %122 = vector.broadcast %121 : vector<1x4xf32> to vector<128x4xf32>
    %123 = arith.addf %119, %122 : vector<128x4xf32>
    %124 = arith.negf %123 : vector<128x4xf32>
    %125 = math.exp %124 : vector<128x4xf32>
    %cst_89 = arith.constant 1.000000e+00 : f32
    %126 = vector.broadcast %cst_89 : f32 to vector<128x4xf32>
    %127 = arith.addf %126, %125 : vector<128x4xf32>
    %128 = arith.divf %126, %127 : vector<128x4xf32>
    %cst_90 = arith.constant 1.002000e+00 : f32
    %129 = vector.broadcast %cst_90 : f32 to vector<128x4xf32>
    %130 = arith.mulf %128, %129 : vector<128x4xf32>
    %cst_91 = arith.constant 1.000000e-03 : f32
    %131 = vector.broadcast %cst_91 : f32 to vector<128x4xf32>
    %132 = arith.subf %130, %131 : vector<128x4xf32>
    %133 = tpu.iota {dimensions = array<i32: 1>} : vector<128x4xi32>
    %c0_i32 = arith.constant 0 : i32
    %134 = vector.broadcast %c0_i32 : i32 to vector<128x4xi32>
    %135 = arith.cmpi eq, %133, %134 : vector<128x4xi32>
    %136 = arith.select %135, %102, %132 : vector<128x4xi1>, vector<128x4xf32>
    %c0_92 = arith.constant 0 : index
    %c0_93 = arith.constant 0 : index
    %137 = vector.load %arg7[%c0_92, %c0_93] : memref<128x4xf32, #tpu.memory_space<vmem>>, vector<128x4xf32>
    tpu.vector_store %arg7[%c0_92, %c0_93], %136 {strides = array<i32>} : memref<128x4xf32, #tpu.memory_space<vmem>>, vector<128x4xf32>,
    return
  }
  func.func @transform_0(%arg0: i32) -> (i32, i32) {
    %c0_i32 = arith.constant 0 : i32
    %c0_i32_0 = arith.constant 0 : i32
    return %arg0, %c0_i32 : i32, i32
  }
  func.func @transform_1(%arg0: i32) -> (i32, i32, i32) {
    %c0_i32 = arith.constant 0 : i32
    %c0_i32_0 = arith.constant 0 : i32
    %c0_i32_1 = arith.constant 0 : i32
    %c0_i32_2 = arith.constant 0 : i32
    return %c0_i32, %c0_i32_0, %c0_i32_1 : i32, i32, i32
  }
  func.func @transform_2(%arg0: i32) -> (i32, i32, i32) {
    %c0_i32 = arith.constant 0 : i32
    %c0_i32_0 = arith.constant 0 : i32
    %c0_i32_1 = arith.constant 0 : i32
    %c0_i32_2 = arith.constant 0 : i32
    return %c0_i32, %c0_i32_0, %c0_i32_1 : i32, i32, i32
  }
  func.func @transform_3(%arg0: i32) -> (i32, i32, i32) {
    %c0_i32 = arith.constant 0 : i32
    %c0_i32_0 = arith.constant 0 : i32
    %c0_i32_1 = arith.constant 0 : i32
    %c0_i32_2 = arith.constant 0 : i32
    return %c0_i32, %c0_i32_0, %c0_i32_1 : i32, i32, i32
  }
  func.func @transform_4(%arg0: i32) -> (i32, i32, i32) {
    %c0_i32 = arith.constant 0 : i32
    %c0_i32_0 = arith.constant 0 : i32
    %c0_i32_1 = arith.constant 0 : i32
    %c0_i32_2 = arith.constant 0 : i32
    return %c0_i32, %c0_i32_0, %c0_i32_1 : i32, i32, i32
  }
  func.func @transform_5(%arg0: i32) -> (i32, i32, i32) {
    %c0_i32 = arith.constant 0 : i32
    %c0_i32_0 = arith.constant 0 : i32
    %c0_i32_1 = arith.constant 0 : i32
    %c0_i32_2 = arith.constant 0 : i32
    return %c0_i32, %c0_i32_0, %c0_i32_1 : i32, i32, i32
  }
  func.func @transform_6(%arg0: i32) -> (i32, i32) {
    %c0_i32 = arith.constant 0 : i32
    %c0_i32_0 = arith.constant 0 : i32
    return %arg0, %c0_i32 : i32, i32
  }
}

</mosaic_0001>

<bundles_post_ra>
// kernel: epi_field_forward.1
= control target key start
LH: loop header
LB: loop body
LE: loop exit
PB: predicated region body
PF: predicated region fallthrough
CT: control target
= control target key end

     0   :  { %s3637_s21 = smov 0   ;;  %s4197_s0 = inlined_call_operand.vmem [shape: f32[256,64], index: 0, kind: input, shape index: {}]   ;;  %s4198_s1 = inlined_call_operand.vmem [shape: bf16[3,64,32], index: 1, kind: input, shape index: {}]   ;;  %s4199_s2 = inlined_call_operand.vmem [shape: bf16[8,32,32], index: 2, kind: input, shape index: {}]   ;;  %s4200_s3 = inlined_call_operand.vmem [shape: f32[9,1,32], index: 3, kind: input, shape index: {}]   ;;  %s4201_s4 = inlined_call_operand.vmem [shape: bf16[2,32,4], index: 4, kind: input, shape index: {}]   ;;  %s4202_s5 = inlined_call_operand.vmem [shape: f32[2,1,4], index: 5, kind: input, shape index: {}]   ;;  %s4203_s6 = inlined_call_operand.vmem [shape: f32[256,4], index: 6, kind: output, shape index: {}]  }
   0x1 LB: > { %s2779_s22 = sadd.s32 4294967295, %s3599_s21   ;;  %p2783_p0 = scmp.ge.s32.totalorder %s3599_s21, 1  ;;  %s3599_s21 = sphi %s3637_s21, %s16_s21  }
   0x2   : > { %p213_p1 = scmp.lt.s32.totalorder %s3599_s21, 3 }
   0x4   : > { %p214_p2 = pnand %p2783_p0, %p213_p1 }
   0x5   : > { %s2784_s25 = sshll.u32 (!%p214_p2), %s2779_s22, 4 }
   0x6   : > { %217 = sbr.rel (%p214_p2) target bundleno = 2182 (0x886), region = 44  ;;  %p244_p3 = scmp.lt.s32.totalorder (!%p214_p2), %s2784_s25, 31 }
   0xb   : > { %v3449_v0 = vld [vmem:[%s4198_s1 + $0x18] sm:$0xff]   ;;  %v3450_v1 = vld [vmem:[%s4198_s1 + $0x10] sm:$0xff]   ;;  %v3451_v2 = vld [vmem:[%s4198_s1 + $0x8] sm:$0xff]   ;;  %s4205_s25 = smov (!%p244_p3, %s2784_s25), 31  ;;  %vm319_vm0 = vcmask 523264   ;;  %vm489_vm1 = vcmask 261120  }
   0xc   : > { %3162 = vmatprep.subr.bf16.mxu0 %v3449_v0  ;;  %v3453_v3 = vld [vmem:[%s4199_s2 + $0x8] sm:$0xff]   ;;  %s2785_s8 = sshll.u32 %s4205_s25, 3  ;;  %v3454_v4 = vld [vmem:[%s4199_s2] sm:$0xff]   ;;  %v3455_v30 = vld [vmem:[%s4199_s2 + $0x18] sm:$0xff]   ;;  %vm2706_vm3 = vcmask 31744  }
   0xd   : > { %3163 = vmatpush3.bf16.msra.mxu0 %v3449_v0  ;;  %s3668_s13 = scalar_lea.vmem %s4197_s0, %s2785_s8  ;;  %3434 = vmatprep.subr.bf16.mxu1 %v3453_v3  ;;  %v3452_v7 = vld [vmem:[%s4198_s1] sm:$0xff]   ;;  %s4118_s10 = scalar_lea.vmem %s4203_s6, %s2785_s8 }
   0xe   : > { %3164 = vmatprep.subr.bf16.mxu0 %v3450_v1  ;;  %v256_v5 = vld [vmem:[%s3668_s13] sm:$0xff]  ;;  %v257_v6 = vld [vmem:[%s3668_s13 + $0x8] sm:$0xff]  ;;  %3436 = vmatpush3.bf16.msra.mxu1 %v3453_v3  ;;  %v258_v9 = vld [vmem:[%s3668_s13 + $0x10] sm:$0xff] }
   0xf   : > { %v3675_v8 = vpack.c.bf16 %v257_v6, %v256_v5  ;;  %3435 = vmatprep.subr.bf16.mxu1 %v3454_v4  ;;  %v259_v10 = vld [vmem:[%s3668_s13 + $0x18] sm:$0xff]  ;;  %v260_v11 = vld [vmem:[%s3668_s13 + $0x20] sm:$0xff]  ;;  %v261_v12 = vld [vmem:[%s3668_s13 + $0x28] sm:$0xff] }
  0x10   : > { %v3683_v13 = vpack.c.bf16 %v259_v10, %v258_v9  ;;  %v3685_v14 = vpack.c.bf16 %v261_v12, %v260_v11  ;;  %v262_v15 = vld [vmem:[%s3668_s13 + $0x30] sm:$0xff]  ;;  %v263_v16 = vld [vmem:[%s3668_s13 + $0x38] sm:$0xff]  ;;  %v264_v17 = vld [vmem:[%s3668_s13 + $0x40] sm:$0xff] }
  0x11   : > { %3165 = vmatpush3.bf16.msra.mxu0 %v3450_v1  ;;  %3170 = vmatprep.mubr.msk.bf16.mxu0 %vm319_vm0, %v3675_v8  ;;  %v265_v18 = vld [vmem:[%s3668_s13 + $0x48] sm:$0xff]  ;;  %v3695_v19 = vpack.c.bf16 %v263_v16, %v262_v15  ;;  %v266_v21 = vld [vmem:[%s3668_s13 + $0x50] sm:$0xff]  ;;  %v267_v22 = vld [vmem:[%s3668_s13 + $0x58] sm:$0xff] }
  0x12   : > { %3166 = vmatprep.subr.bf16.mxu0 %v3451_v2  ;;  %3437 = vmatpush3.bf16.msra.mxu1 %v3454_v4  ;;  %v3697_v20 = vpack.c.bf16 %v265_v18, %v264_v17  ;;  %v268_v23 = vld [vmem:[%s3668_s13 + $0x60] sm:$0xff]  ;;  %v269_v24 = vld [vmem:[%s3668_s13 + $0x68] sm:$0xff]  ;;  %v3707_v25 = vpack.c.bf16 %v267_v22, %v266_v21  ;;  %v270_v27 = vld [vmem:[%s3668_s13 + $0x70] sm:$0xff] }
  0x13   : > { %v3709_v26 = vpack.c.bf16 %v269_v24, %v268_v23  ;;  %v271_v28 = vld [vmem:[%s3668_s13 + $0x78] sm:$0xff]  ;;  %3206 = vmatprep.subr.bf16.mxu1 %v3455_v30  ;;  %v2788_v33 = vld [vmem:[%s4200_s3] ss:$0 sm:$0xff] }
  0x14   : > { %v3717_v29 = vpack.c.bf16 %v271_v28, %v270_v27 }
  0x15   : > { %3167 = vmatpush3.bf16.msra.mxu0 %v3451_v2 }
  0x16   : > { %3168 = vmatprep.subr.bf16.mxu0 %v3452_v7 }
  0x19   : > { %3169 = vmatpush3.bf16.msra.mxu0 %v3452_v7 }
  0x1a   : > { %3186 = vmatprep.subr.bf16.mxu0 %v3453_v3 }
  0x1c   : > { %3171 = vmatmul.mubr.msk.bf16.vlgmr.msra.gmra.mxu0 %vm319_vm0, %v3683_v13 }
  0x1d   : > { %3174 = vmatprep.mubr.msk.bf16.mxu0 %vm319_vm0, %v3685_v14  ;;  %3187 = vmatpush3.bf16.msra.mxu0 %v3453_v3 }
  0x1e   : > { %3188 = vmatprep.subr.bf16.mxu0 %v3454_v4 }
  0x21   : > { %3189 = vmatpush3.bf16.msra.mxu0 %v3454_v4 }
  0x24   : > { %3175 = vmatmul.mubr.msk.bf16.gmra.mxu0 %vm319_vm0, %v3695_v19 }
  0x25   : > { %3178 = vmatprep.mubr.msk.bf16.mxu0 %vm319_vm0, %v3697_v20 }
  0x2c   : > { %3179 = vmatmul.mubr.msk.bf16.gmra.mxu0 %vm319_vm0, %v3707_v25 }
  0x2d   : > { %3182 = vmatprep.mubr.msk.bf16.mxu0 %vm319_vm0, %v3709_v26 }
  0x34   : > { %3183 = vmatmul.mubr.msk.bf16.gmra.mxu0 %vm319_vm0, %v3717_v29 }
  0xdc   : > { %v3172_v31 = vpop.f32.mrf.mxu0 }
  0xdd   : > { %v387_v37 = vadd.f32 %v3172_v31, %v2788_v33 }
  0xde   : > { %v378_v32 = vpop.f32.mrf.mxu0 }
  0xdf   : > { %v379_v35 = vadd.f32 %v2788_v33, %v378_v32  ;;  %v443_v44 = vmax.f32 %v387_v37, 0.0  ;;  %v3456_v32 = vld [vmem:[%s4199_s2 + $0x10] sm:$0xff]  }
  0xe0   : > { %v3173_v34 = vpop.f32.mrf.mxu0 }
  0xe1   : > { %v390_v36 = vadd.f32 %v3173_v34, %v2788_v33  ;;  %v441_v42 = vmax.f32 %v379_v35, 0.0 }
  0xe2   : > { %v381_v38 = vpop.f32.mrf.mxu0 }
  0xe3   : > { %v382_v39 = vadd.f32 %v2788_v33, %v381_v38  ;;  %v444_v40 = vmax.f32 %v390_v36, 0.0 }
  0xe4   : > { %v3176_v41 = vpop.f32.mrf.mxu0 }
  0xe5   : > { %v442_v43 = vmax.f32 %v382_v39, 0.0  ;;  %v458_v47 = vpack.c.bf16 %v444_v40, %v443_v44  ;;  %v403_v51 = vadd.f32 %v3176_v41, %v2788_v33 }
  0xe6   : > { %v394_v45 = vpop.f32.mrf.mxu0 }
  0xe7   : > { %v457_v46 = vpack.c.bf16 %v442_v43, %v441_v42  ;;  %v395_v49 = vadd.f32 %v2788_v33, %v394_v45  ;;  %v447_v58 = vmax.f32 %v403_v51, 0.0 }
  0xe8   : > { %v3177_v48 = vpop.f32.mrf.mxu0 }
  0xe9   : > { %v406_v50 = vadd.f32 %v3177_v48, %v2788_v33  ;;  %3190 = vmatprep.mubr.msk.bf16.mxu0 %vm489_vm1, %v457_v46  ;;  %v445_v56 = vmax.f32 %v395_v49, 0.0 }
  0xea   : > { %v397_v52 = vpop.f32.mrf.mxu0  ;;  %3191 = vmatmul.mubr.msk.bf16.vlgmr.msra.gmra.mxu0 %vm489_vm1, %v458_v47 }
  0xeb   : > { %v398_v53 = vadd.f32 %v2788_v33, %v397_v52  ;;  %v448_v54 = vmax.f32 %v406_v50, 0.0 }
  0xec   : > { %v3180_v55 = vpop.f32.mrf.mxu0 }
  0xed   : > { %v446_v57 = vmax.f32 %v398_v53, 0.0  ;;  %v460_v61 = vpack.c.bf16 %v448_v54, %v447_v58  ;;  %v419_v1 = vadd.f32 %v3180_v55, %v2788_v33 }
  0xee   : > { %v410_v59 = vpop.f32.mrf.mxu0 }
  0xef   : > { %v459_v60 = vpack.c.bf16 %v446_v57, %v445_v56  ;;  %v411_v63 = vadd.f32 %v2788_v33, %v410_v59  ;;  %v451_v9 = vmax.f32 %v419_v1, 0.0 }
  0xf0   : > { %v3181_v62 = vpop.f32.mrf.mxu0 }
  0xf1   : > { %v422_v0 = vadd.f32 %v3181_v62, %v2788_v33  ;;  %3194 = vmatprep.mubr.msk.bf16.mxu1 %vm489_vm1, %v459_v60  ;;  %v449_v6 = vmax.f32 %v411_v63, 0.0 }
  0xf2   : > { %v413_v2 = vpop.f32.mrf.mxu0  ;;  %3195 = vmatmul.mubr.msk.bf16.vlgmr.msra.gmra.mxu1 %vm489_vm1, %v460_v61 }
  0xf3   : > { %v414_v3 = vadd.f32 %v2788_v33, %v413_v2  ;;  %3207 = vmatpush3.bf16.msra.mxu1 %v3455_v30  ;;  %v452_v4 = vmax.f32 %v422_v0, 0.0 }
  0xf4   : > { %v3184_v5 = vpop.f32.mrf.mxu0  ;;  %3208 = vmatprep.subr.bf16.mxu1 %v3456_v32 }
  0xf5   : > { %v450_v7 = vmax.f32 %v414_v3, 0.0  ;;  %v462_v12 = vpack.c.bf16 %v452_v4, %v451_v9  ;;  %v435_v18 = vadd.f32 %v3184_v5, %v2788_v33 }
  0xf6   : > { %v426_v10 = vpop.f32.mrf.mxu0 }
  0xf7   : > { %v461_v11 = vpack.c.bf16 %v450_v7, %v449_v6  ;;  %v427_v16 = vadd.f32 %v2788_v33, %v426_v10  ;;  %v455_v28 = vmax.f32 %v435_v18, 0.0  ;;  %3209 = vmatpush3.bf16.msra.mxu1 %v3456_v32 }
  0xf8   : > { %v3185_v15 = vpop.f32.mrf.mxu0 }
  0xf9   : > { %v438_v17 = vadd.f32 %v3185_v15, %v2788_v33  ;;  %3198 = vmatprep.mubr.msk.bf16.mxu1 %vm489_vm1, %v461_v11  ;;  %v453_v24 = vmax.f32 %v427_v16, 0.0 }
  0xfa   : > { %v429_v21 = vpop.f32.mrf.mxu0  ;;  %3199 = vmatmul.mubr.msk.bf16.gmra.mxu1 %vm489_vm1, %v462_v12 }
  0xfb   : > { %v430_v22 = vadd.f32 %v2788_v33, %v429_v21  ;;  %v456_v23 = vmax.f32 %v438_v17, 0.0  ;;  %v2802_v33 = vld [vmem:[%s4200_s3 + $0x1] ss:$0 sm:$0xff] }
  0xfd   : > { %v454_v27 = vmax.f32 %v430_v22, 0.0  ;;  %v464_v31 = vpack.c.bf16 %v456_v23, %v455_v28 }
  0xff   : > { %v463_v30 = vpack.c.bf16 %v454_v27, %v453_v24 }
 0x101   : > { %3202 = vmatprep.mubr.msk.bf16.mxu1 %vm489_vm1, %v463_v30 }
 0x102   : > { %3203 = vmatmul.mubr.msk.bf16.gmra.mxu1 %vm489_vm1, %v464_v31 }
 0x1aa   : > { %v3192_v34 = vpop.f32.mrf.mxu0 }
 0x1ab   : > { %v557_v39 = vadd.f32 %v3192_v34, %v2802_v33 }
 0x1ac   : > { %v548_v35 = vpop.f32.mrf.mxu0 }
 0x1ad   : > { %v549_v37 = vadd.f32 %v2802_v33, %v548_v35  ;;  %v613_v46 = vmax.f32 %v557_v39, 0.0  ;;  %v3457_v35 = vld [vmem:[%s4199_s2 + $0x28] sm:$0xff]  }
 0x1ae   : > { %v3193_v36 = vpop.f32.mrf.mxu0  ;;  %3226 = vmatprep.subr.bf16.mxu0 %v3457_v35  ;;  %v3462_v39 = vld [vmem:[%s4198_s1 + $0x28] sm:$0xff]  }
 0x1af   : > { %v560_v38 = vadd.f32 %v3193_v36, %v2802_v33  ;;  %v611_v44 = vmax.f32 %v549_v37, 0.0  ;;  %3227 = vmatpush3.bf16.msra.mxu0 %v3457_v35  ;;  %v3459_v36 = vld [vmem:[%s4198_s1 + $0x38] sm:$0xff]  }
 0x1b0   : > { %v551_v40 = vpop.f32.mrf.mxu0  ;;  %v3460_v37 = vld [vmem:[%s4199_s2 + $0x38] sm:$0xff]   ;;  %3246 = vmatprep.subr.bf16.mxu1 %v3459_v36 }
 0x1b1   : > { %v552_v41 = vadd.f32 %v2802_v33, %v551_v40  ;;  %v614_v42 = vmax.f32 %v560_v38, 0.0  ;;  %v3461_v38 = vld [vmem:[%s4198_s1 + $0x30] sm:$0xff]  }
 0x1b2   : > { %v3196_v43 = vpop.f32.mrf.mxu1 }
 0x1b3   : > { %v612_v45 = vmax.f32 %v552_v41, 0.0  ;;  %v628_v49 = vpack.c.bf16 %v614_v42, %v613_v46  ;;  %v573_v53 = vadd.f32 %v3196_v43, %v2802_v33  ;;  %v2818_v42 = vld [vmem:[%s4200_s3 + $0x2] ss:$0 sm:$0xff] }
 0x1b4   : > { %v564_v47 = vpop.f32.mrf.mxu1 }
 0x1b5   : > { %v627_v48 = vpack.c.bf16 %v612_v45, %v611_v44  ;;  %v565_v51 = vadd.f32 %v2802_v33, %v564_v47  ;;  %v617_v60 = vmax.f32 %v573_v53, 0.0 }
 0x1b6   : > { %v3197_v50 = vpop.f32.mrf.mxu1 }
 0x1b7   : > { %v576_v52 = vadd.f32 %v3197_v50, %v2802_v33  ;;  %3210 = vmatprep.mubr.msk.bf16.mxu1 %vm489_vm1, %v627_v48  ;;  %v615_v58 = vmax.f32 %v565_v51, 0.0 }
 0x1b8   : > { %v567_v54 = vpop.f32.mrf.mxu1  ;;  %3211 = vmatmul.mubr.msk.bf16.vlgmr.msra.gmra.mxu1 %vm489_vm1, %v628_v49 }
 0x1b9   : > { %v568_v55 = vadd.f32 %v2802_v33, %v567_v54  ;;  %v618_v56 = vmax.f32 %v576_v52, 0.0  ;;  %3247 = vmatpush3.bf16.msra.mxu1 %v3459_v36 }
 0x1ba   : > { %v3200_v57 = vpop.f32.mrf.mxu1  ;;  %3248 = vmatprep.subr.bf16.mxu1 %v3461_v38 }
 0x1bb   : > { %v616_v59 = vmax.f32 %v568_v55, 0.0  ;;  %v630_v63 = vpack.c.bf16 %v618_v56, %v617_v60  ;;  %v589_v3 = vadd.f32 %v3200_v57, %v2802_v33 }
 0x1bc   : > { %v580_v61 = vpop.f32.mrf.mxu1 }
 0x1bd   : > { %v629_v62 = vpack.c.bf16 %v616_v59, %v615_v58  ;;  %v581_v1 = vadd.f32 %v2802_v33, %v580_v61  ;;  %v621_v11 = vmax.f32 %v589_v3, 0.0  ;;  %3249 = vmatpush3.bf16.msra.mxu1 %v3461_v38  ;;  %v3463_v58 = vld [vmem:[%s4199_s2 + $0x30] sm:$0xff]  }
 0x1be   : > { %v3201_v0 = vpop.f32.mrf.mxu1  ;;  %3250 = vmatprep.subr.bf16.mxu1 %v3462_v39 }
 0x1bf   : > { %v592_v2 = vadd.f32 %v3201_v0, %v2802_v33  ;;  %3214 = vmatprep.mubr.msk.bf16.mxu1 %vm489_vm1, %v629_v62  ;;  %v619_v9 = vmax.f32 %v581_v1, 0.0 }
 0x1c0   : > { %v583_v4 = vpop.f32.mrf.mxu1  ;;  %3215 = vmatmul.mubr.msk.bf16.gmra.mxu1 %vm489_vm1, %v630_v63 }
 0x1c1   : > { %v584_v5 = vadd.f32 %v2802_v33, %v583_v4  ;;  %v622_v6 = vmax.f32 %v592_v2, 0.0  ;;  %3251 = vmatpush3.bf16.msra.mxu1 %v3462_v39 }
 0x1c2   : > { %v3204_v7 = vpop.f32.mrf.mxu1 }
 0x1c3   : > { %v620_v10 = vmax.f32 %v584_v5, 0.0  ;;  %v632_v16 = vpack.c.bf16 %v622_v6, %v621_v11  ;;  %v605_v22 = vadd.f32 %v3204_v7, %v2802_v33 }
 0x1c4   : > { %v596_v12 = vpop.f32.mrf.mxu1 }
 0x1c5   : > { %v631_v15 = vpack.c.bf16 %v620_v10, %v619_v9  ;;  %v597_v18 = vadd.f32 %v2802_v33, %v596_v12  ;;  %v625_v31 = vmax.f32 %v605_v22, 0.0 }
 0x1c6   : > { %v3205_v17 = vpop.f32.mrf.mxu1 }
 0x1c7   : > { %v608_v21 = vadd.f32 %v3205_v17, %v2802_v33  ;;  %3218 = vmatprep.mubr.msk.bf16.mxu1 %vm489_vm1, %v631_v15  ;;  %v623_v28 = vmax.f32 %v597_v18, 0.0 }
 0x1c8   : > { %v599_v23 = vpop.f32.mrf.mxu1  ;;  %3219 = vmatmul.mubr.msk.bf16.gmra.mxu1 %vm489_vm1, %v632_v16 }
 0x1c9   : > { %v600_v24 = vadd.f32 %v2802_v33, %v599_v23  ;;  %v626_v27 = vmax.f32 %v608_v21, 0.0  ;;  %v3458_v33 = vld [vmem:[%s4199_s2 + $0x20] sm:$0xff]  }
 0x1ca   : > { %3228 = vmatprep.subr.bf16.mxu0 %v3458_v33 }
 0x1cb   : > { %v624_v30 = vmax.f32 %v600_v24, 0.0  ;;  %v634_v34 = vpack.c.bf16 %v626_v27, %v625_v31  ;;  %3229 = vmatpush3.bf16.msra.mxu0 %v3458_v33 }
 0x1cc   : > { %3270 = vmatprep.subr.bf16.mxu0 %v3460_v37 }
 0x1cd   : > { %v633_v32 = vpack.c.bf16 %v624_v30, %v623_v28 }
 0x1cf   : > { %3222 = vmatprep.mubr.msk.bf16.mxu1 %vm489_vm1, %v633_v32 }
 0x1d0   : > { %3223 = vmatmul.mubr.msk.bf16.gmra.mxu1 %vm489_vm1, %v634_v34 }
 0x1d1   : > { %3254 = vmatprep.mubr.msk.bf16.mxu1 %vm319_vm0, %v3675_v8 }
 0x278   : > { %v3212_v40 = vpop.f32.mrf.mxu1 }
 0x279   : > { %v727_v46 = vadd.f32 %v3212_v40, %v2818_v42 }
 0x27a   : > { %v718_v41 = vpop.f32.mrf.mxu1 }
 0x27b   : > { %v719_v44 = vadd.f32 %v2818_v42, %v718_v41  ;;  %v783_v53 = vmax.f32 %v727_v46, 0.0 }
 0x27c   : > { %v3213_v43 = vpop.f32.mrf.mxu1 }
 0x27d   : > { %v730_v45 = vadd.f32 %v3213_v43, %v2818_v42  ;;  %v781_v51 = vmax.f32 %v719_v44, 0.0  ;;  %v3464_v43 = vld [vmem:[%s4198_s1 + $0x20] sm:$0xff]  }
 0x27e   : > { %v721_v47 = vpop.f32.mrf.mxu1  ;;  %3252 = vmatprep.subr.bf16.mxu1 %v3464_v43  ;;  %v3466_v44 = vld [vmem:[%s4199_s2 + $0x40] sm:$0xff]  }
 0x27f   : > { %v722_v48 = vadd.f32 %v2818_v42, %v721_v47  ;;  %v784_v49 = vmax.f32 %v730_v45, 0.0  ;;  %3253 = vmatpush3.bf16.msra.mxu1 %v3464_v43  ;;  %v2834_v47 = vld [vmem:[%s4200_s3 + $0x3] ss:$0 sm:$0xff] }
 0x280   : > { %v3216_v50 = vpop.f32.mrf.mxu1 }
 0x281   : > { %v782_v52 = vmax.f32 %v722_v48, 0.0  ;;  %v798_v56 = vpack.c.bf16 %v784_v49, %v783_v53  ;;  %v743_v61 = vadd.f32 %v3216_v50, %v2818_v42 }
 0x282   : > { %v734_v54 = vpop.f32.mrf.mxu1  ;;  %3255 = vmatmul.mubr.msk.bf16.vlgmr.msra.gmra.mxu1 %vm319_vm0, %v3683_v13 }
 0x283   : > { %v797_v55 = vpack.c.bf16 %v782_v52, %v781_v51  ;;  %v735_v59 = vadd.f32 %v2818_v42, %v734_v54  ;;  %v787_v4 = vmax.f32 %v743_v61, 0.0  ;;  %3258 = vmatprep.mubr.msk.bf16.mxu1 %vm319_vm0, %v3685_v14 }
 0x284   : > { %v3217_v57 = vpop.f32.mrf.mxu1 }
 0x285   : > { %v746_v60 = vadd.f32 %v3217_v57, %v2818_v42  ;;  %3230 = vmatprep.mubr.msk.bf16.mxu0 %vm489_vm1, %v797_v55  ;;  %v785_v2 = vmax.f32 %v735_v59, 0.0 }
 0x286   : > { %v737_v62 = vpop.f32.mrf.mxu1  ;;  %3231 = vmatmul.mubr.msk.bf16.vlgmr.msra.gmra.mxu0 %vm489_vm1, %v798_v56 }
 0x287   : > { %v738_v63 = vadd.f32 %v2818_v42, %v737_v62  ;;  %3271 = vmatpush3.bf16.msra.mxu0 %v3460_v37  ;;  %v788_v0 = vmax.f32 %v746_v60, 0.0 }
 0x288   : > { %v3220_v1 = vpop.f32.mrf.mxu1  ;;  %3272 = vmatprep.subr.bf16.mxu0 %v3463_v58 }
 0x289   : > { %v786_v3 = vmax.f32 %v738_v63, 0.0  ;;  %v800_v7 = vpack.c.bf16 %v788_v0, %v787_v4  ;;  %v759_v12 = vadd.f32 %v3220_v1, %v2818_v42 }
 0x28a   : > { %v750_v5 = vpop.f32.mrf.mxu1  ;;  %3259 = vmatmul.mubr.msk.bf16.gmra.mxu1 %vm319_vm0, %v3695_v19 }
 0x28b   : > { %v799_v6 = vpack.c.bf16 %v786_v3, %v785_v2  ;;  %3273 = vmatpush3.bf16.msra.mxu0 %v3463_v58  ;;  %v751_v10 = vadd.f32 %v2818_v42, %v750_v5  ;;  %v791_v23 = vmax.f32 %v759_v12, 0.0  ;;  %3262 = vmatprep.mubr.msk.bf16.mxu1 %vm319_vm0, %v3697_v20 }
 0x28c   : > { %v3221_v9 = vpop.f32.mrf.mxu1 }
 0x28d   : > { %v762_v11 = vadd.f32 %v3221_v9, %v2818_v42  ;;  %3234 = vmatprep.mubr.msk.bf16.mxu0 %vm489_vm1, %v799_v6  ;;  %v789_v21 = vmax.f32 %v751_v10, 0.0 }
 0x28e   : > { %v753_v15 = vpop.f32.mrf.mxu1  ;;  %3235 = vmatmul.mubr.msk.bf16.gmra.mxu0 %vm489_vm1, %v800_v7 }
 0x28f   : > { %v754_v16 = vadd.f32 %v2818_v42, %v753_v15  ;;  %v792_v17 = vmax.f32 %v762_v11, 0.0 }
 0x290   : > { %v3224_v18 = vpop.f32.mrf.mxu1 }
 0x291   : > { %v790_v22 = vmax.f32 %v754_v16, 0.0  ;;  %v802_v28 = vpack.c.bf16 %v792_v17, %v791_v23  ;;  %v775_v34 = vadd.f32 %v3224_v18, %v2818_v42 }
 0x292   : > { %v766_v24 = vpop.f32.mrf.mxu1  ;;  %3263 = vmatmul.mubr.msk.bf16.gmra.mxu1 %vm319_vm0, %v3707_v25 }
 0x293   : > { %v801_v27 = vpack.c.bf16 %v790_v22, %v789_v21  ;;  %v767_v31 = vadd.f32 %v2818_v42, %v766_v24  ;;  %v795_v39 = vmax.f32 %v775_v34, 0.0  ;;  %3266 = vmatprep.mubr.msk.bf16.mxu1 %vm319_vm0, %v3709_v26 }
 0x294   : > { %v3225_v30 = vpop.f32.mrf.mxu1 }
 0x295   : > { %v778_v32 = vadd.f32 %v3225_v30, %v2818_v42  ;;  %3238 = vmatprep.mubr.msk.bf16.mxu0 %vm489_vm1, %v801_v27  ;;  %v793_v37 = vmax.f32 %v767_v31, 0.0 }
 0x296   : > { %v769_v35 = vpop.f32.mrf.mxu1  ;;  %3239 = vmatmul.mubr.msk.bf16.gmra.mxu0 %vm489_vm1, %v802_v28 }
 0x297   : > { %v770_v33 = vadd.f32 %v2818_v42, %v769_v35  ;;  %v796_v36 = vmax.f32 %v778_v32, 0.0  ;;  %v3465_v42 = vld [vmem:[%s4199_s2 + $0x48] sm:$0xff]  }
 0x298   : > { %3290 = vmatprep.subr.bf16.mxu1 %v3465_v42 }
 0x299   : > { %v794_v38 = vmax.f32 %v770_v33, 0.0  ;;  %v804_v41 = vpack.c.bf16 %v796_v36, %v795_v39  ;;  %3291 = vmatpush3.bf16.msra.mxu1 %v3465_v42 }
 0x29a   : > { %3267 = vmatmul.mubr.msk.bf16.gmra.mxu1 %vm319_vm0, %v3717_v29  ;;  %3292 = vmatprep.subr.bf16.mxu1 %v3466_v44 }
 0x29b   : > { %v803_v40 = vpack.c.bf16 %v794_v38, %v793_v37 }
 0x29d   : > { %3242 = vmatprep.mubr.msk.bf16.mxu0 %vm489_vm1, %v803_v40  ;;  %3293 = vmatpush3.bf16.msra.mxu1 %v3466_v44 }
 0x29e   : > { %3243 = vmatmul.mubr.msk.bf16.gmra.mxu0 %vm489_vm1, %v804_v41 }
 0x346   : > { %v3232_v45 = vpop.f32.mrf.mxu0 }
 0x347   : > { %v897_v51 = vadd.f32 %v3232_v45, %v2834_v47 }
 0x348   : > { %v888_v46 = vpop.f32.mrf.mxu0 }
 0x349   : > { %v889_v49 = vadd.f32 %v2834_v47, %v888_v46  ;;  %v953_v58 = vmax.f32 %v897_v51, 0.0  ;;  %v3467_v46 = vld [vmem:[%s4199_s2 + $0x58] sm:$0xff]  }
 0x34a   : > { %v3233_v48 = vpop.f32.mrf.mxu0  ;;  %3310 = vmatprep.subr.bf16.mxu0 %v3467_v46 }
 0x34b   : > { %v900_v50 = vadd.f32 %v3233_v48, %v2834_v47  ;;  %v951_v56 = vmax.f32 %v889_v49, 0.0  ;;  %v3468_v48 = vld [vmem:[%s4199_s2 + $0x50] sm:$0xff]  }
 0x34c   : > { %v891_v52 = vpop.f32.mrf.mxu0 }
 0x34d   : > { %v892_v53 = vadd.f32 %v2834_v47, %v891_v52  ;;  %v954_v54 = vmax.f32 %v900_v50, 0.0 }
 0x34e   : > { %v3236_v55 = vpop.f32.mrf.mxu0 }
 0x34f   : > { %v952_v57 = vmax.f32 %v892_v53, 0.0  ;;  %v968_v61 = vpack.c.bf16 %v954_v54, %v953_v58  ;;  %v913_v1 = vadd.f32 %v3236_v55, %v2834_v47 }
 0x350   : > { %v904_v59 = vpop.f32.mrf.mxu0 }
 0x351   : > { %v967_v60 = vpack.c.bf16 %v952_v57, %v951_v56  ;;  %v905_v63 = vadd.f32 %v2834_v47, %v904_v59  ;;  %v957_v9 = vmax.f32 %v913_v1, 0.0 }
 0x352   : > { %v3237_v62 = vpop.f32.mrf.mxu0 }
 0x353   : > { %v916_v0 = vadd.f32 %v3237_v62, %v2834_v47  ;;  %3274 = vmatprep.mubr.msk.bf16.mxu0 %vm489_vm1, %v967_v60  ;;  %v955_v6 = vmax.f32 %v905_v63, 0.0  ;;  %v3826_v62 = vld [vmem:[%s4200_s3 + $0x4] ss:$0 sm:$0xff] }
 0x354   : > { %v907_v2 = vpop.f32.mrf.mxu0  ;;  %3275 = vmatmul.mubr.msk.bf16.vlgmr.msra.gmra.mxu0 %vm489_vm1, %v968_v61 }
 0x355   : > { %v908_v3 = vadd.f32 %v2834_v47, %v907_v2  ;;  %v958_v4 = vmax.f32 %v916_v0, 0.0  ;;  %3311 = vmatpush3.bf16.msra.mxu0 %v3467_v46 }
 0x356   : > { %v3240_v5 = vpop.f32.mrf.mxu0  ;;  %3312 = vmatprep.subr.bf16.mxu0 %v3468_v48 }
 0x357   : > { %v956_v7 = vmax.f32 %v908_v3, 0.0  ;;  %v970_v12 = vpack.c.bf16 %v958_v4, %v957_v9  ;;  %v929_v18 = vadd.f32 %v3240_v5, %v2834_v47 }
 0x358   : > { %v920_v10 = vpop.f32.mrf.mxu0 }
 0x359   : > { %v969_v11 = vpack.c.bf16 %v956_v7, %v955_v6  ;;  %v921_v16 = vadd.f32 %v2834_v47, %v920_v10  ;;  %v961_v30 = vmax.f32 %v929_v18, 0.0  ;;  %3313 = vmatpush3.bf16.msra.mxu0 %v3468_v48 }
 0x35a   : > { %v3241_v15 = vpop.f32.mrf.mxu0 }
 0x35b   : > { %v932_v17 = vadd.f32 %v3241_v15, %v2834_v47  ;;  %3278 = vmatprep.mubr.msk.bf16.mxu0 %vm489_vm1, %v969_v11  ;;  %v959_v27 = vmax.f32 %v921_v16, 0.0 }
 0x35c   : > { %v923_v21 = vpop.f32.mrf.mxu0  ;;  %3279 = vmatmul.mubr.msk.bf16.gmra.mxu0 %vm489_vm1, %v970_v12 }
 0x35d   : > { %v924_v22 = vadd.f32 %v2834_v47, %v923_v21  ;;  %v962_v23 = vmax.f32 %v932_v17, 0.0 }
 0x35e   : > { %v3244_v24 = vpop.f32.mrf.mxu0 }
 0x35f   : > { %v960_v28 = vmax.f32 %v924_v22, 0.0  ;;  %v972_v34 = vpack.c.bf16 %v962_v23, %v961_v30  ;;  %v945_v37 = vadd.f32 %v3244_v24, %v2834_v47 }
 0x360   : > { %v936_v31 = vpop.f32.mrf.mxu0 }
 0x361   : > { %v971_v32 = vpack.c.bf16 %v960_v28, %v959_v27  ;;  %v937_v33 = vadd.f32 %v2834_v47, %v936_v31  ;;  %v965_v42 = vmax.f32 %v945_v37, 0.0 }
 0x362   : > { %v3245_v35 = vpop.f32.mrf.mxu0 }
 0x363   : > { %v948_v36 = vadd.f32 %v3245_v35, %v2834_v47  ;;  %3282 = vmatprep.mubr.msk.bf16.mxu0 %vm489_vm1, %v971_v32  ;;  %v963_v41 = vmax.f32 %v937_v33, 0.0 }
 0x364   : > { %v939_v38 = vpop.f32.mrf.mxu0  ;;  %3283 = vmatmul.mubr.msk.bf16.gmra.mxu0 %vm489_vm1, %v972_v34 }
 0x365   : > { %v940_v39 = vadd.f32 %v2834_v47, %v939_v38  ;;  %v966_v40 = vmax.f32 %v948_v36, 0.0  ;;  %v3256_v47 = vpop.f32.mrf.mxu1 }
 0x367   : > { %v964_v43 = vmax.f32 %v940_v39, 0.0  ;;  %v974_v45 = vpack.c.bf16 %v966_v40, %v965_v42  ;;  %v1047_v49 = vpop.f32.mrf.mxu1 }
 0x369   : > { %v973_v44 = vpack.c.bf16 %v964_v43, %v963_v41  ;;  %v3257_v50 = vpop.f32.mrf.mxu1 }
 0x36b   : > { %3286 = vmatprep.mubr.msk.bf16.mxu0 %vm489_vm1, %v973_v44  ;;  %v1050_v51 = vpop.f32.mrf.mxu1 }
 0x36c   : > { %3287 = vmatmul.mubr.msk.bf16.gmra.mxu0 %vm489_vm1, %v974_v45 }
 0x36d   : > { %v3260_v52 = vpop.f32.mrf.mxu1 }
 0x36f   : > { %v1063_v53 = vpop.f32.mrf.mxu1 }
 0x371   : > { %v3261_v54 = vpop.f32.mrf.mxu1 }
 0x373   : > { %v1066_v55 = vpop.f32.mrf.mxu1 }
 0x375   : > { %v3264_v58 = vpop.f32.mrf.mxu1 }
 0x377   : > { %v1079_v1 = vpop.f32.mrf.mxu1 }
 0x379   : > { %v3265_v11 = vpop.f32.mrf.mxu1 }
 0x37b   : > { %v1082_v28 = vpop.f32.mrf.mxu1 }
 0x37d   : > { %v3268_v37 = vpop.f32.mrf.mxu1 }
 0x414   : > { %v3276_v56 = vpop.f32.mrf.mxu0 }
 0x415   : > { %v1189_v60 = vadd.f32 %v3276_v56, %v3256_v47  ;;  %v1095_v47 = vpop.f32.mrf.mxu1 }
 0x416   : > { %v1180_v57 = vpop.f32.mrf.mxu0 }
 0x417   : > { %v1181_v59 = vadd.f32 %v1180_v57, %v1047_v49  ;;  %v1253_v5 = vadd.f32 %v3826_v62, %v1189_v60  ;;  %v3269_v57 = vpop.f32.mrf.mxu1 }
 0x418   : > { %v3277_v61 = vpop.f32.mrf.mxu0 }
 0x419   : > { %v1192_v63 = vadd.f32 %v3277_v61, %v3257_v50  ;;  %v1251_v2 = vadd.f32 %v3826_v62, %v1181_v59  ;;  %v1269_v17 = vmax.f32 %v1253_v5, 0.0  ;;  %v1098_v5 = vpop.f32.mrf.mxu1 }
 0x41a   : > { %v1183_v0 = vpop.f32.mrf.mxu0 }
 0x41b   : > { %v1254_v3 = vadd.f32 %v3826_v62, %v1192_v63  ;;  %v1184_v4 = vadd.f32 %v1183_v0, %v1050_v51  ;;  %v1267_v12 = vmax.f32 %v1251_v2, 0.0 }
 0x41c   : > { %v3280_v6 = vpop.f32.mrf.mxu0 }
 0x41d   : > { %v1252_v7 = vadd.f32 %v3826_v62, %v1184_v4  ;;  %v1270_v9 = vmax.f32 %v1254_v3, 0.0  ;;  %v1205_v18 = vadd.f32 %v3280_v6, %v3260_v52 }
 0x41e   : > { %v1196_v10 = vpop.f32.mrf.mxu0 }
 0x41f   : > { %v1268_v15 = vmax.f32 %v1252_v7, 0.0  ;;  %v1197_v16 = vadd.f32 %v1196_v10, %v1063_v53  ;;  %v1284_v24 = vpack.c.bf16 %v1270_v9, %v1269_v17  ;;  %v1257_v34 = vadd.f32 %v3826_v62, %v1205_v18 }
 0x420   : > { %v3281_v21 = vpop.f32.mrf.mxu0 }
 0x421   : > { %v1283_v22 = vpack.c.bf16 %v1268_v15, %v1267_v12  ;;  %v1208_v23 = vadd.f32 %v3281_v21, %v3261_v54  ;;  %v1255_v30 = vadd.f32 %v3826_v62, %v1197_v16  ;;  %v1273_v43 = vmax.f32 %v1257_v34, 0.0 }
 0x422   : > { %v1199_v27 = vpop.f32.mrf.mxu0 }
 0x423   : > { %v1258_v31 = vadd.f32 %v3826_v62, %v1208_v23  ;;  %v1200_v32 = vadd.f32 %v1199_v27, %v1066_v55  ;;  %3294 = vmatprep.mubr.msk.bf16.mxu1 %vm489_vm1, %v1283_v22  ;;  %v1271_v39 = vmax.f32 %v1255_v30, 0.0  ;;  %v3469_v23 = vld [vmem:[%s4199_s2 + $0x68] sm:$0xff]  }
 0x424   : > { %v3284_v35 = vpop.f32.mrf.mxu0  ;;  %3295 = vmatmul.mubr.msk.bf16.vlgmr.msra.gmra.mxu1 %vm489_vm1, %v1284_v24  ;;  %v3470_v24 = vld [vmem:[%s4199_s2 + $0x60] sm:$0xff]   ;;  %3330 = vmatprep.subr.bf16.mxu1 %v3469_v23 }
 0x425   : > { %v1256_v33 = vadd.f32 %v3826_v62, %v1200_v32  ;;  %v1274_v36 = vmax.f32 %v1258_v31, 0.0  ;;  %v1221_v42 = vadd.f32 %v3284_v35, %v3264_v58  ;;  %3331 = vmatpush3.bf16.msra.mxu1 %v3469_v23 }
 0x426   : > { %v1212_v38 = vpop.f32.mrf.mxu0  ;;  %3332 = vmatprep.subr.bf16.mxu1 %v3470_v24 }
 0x427   : > { %v1272_v40 = vmax.f32 %v1256_v33, 0.0  ;;  %v1213_v41 = vadd.f32 %v1212_v38, %v1079_v1  ;;  %v1286_v48 = vpack.c.bf16 %v1274_v36, %v1273_v43  ;;  %v1261_v53 = vadd.f32 %v3826_v62, %v1221_v42 }
 0x428   : > { %v3285_v44 = vpop.f32.mrf.mxu0 }
 0x429   : > { %v1285_v45 = vpack.c.bf16 %v1272_v40, %v1271_v39  ;;  %v1224_v46 = vadd.f32 %v3285_v44, %v3265_v11  ;;  %v1259_v50 = vadd.f32 %v3826_v62, %v1213_v41  ;;  %v1277_v63 = vmax.f32 %v1261_v53, 0.0  ;;  %3333 = vmatpush3.bf16.msra.mxu1 %v3470_v24 }
 0x42a   : > { %v1215_v49 = vpop.f32.mrf.mxu0 }
 0x42b   : > { %v1262_v51 = vadd.f32 %v3826_v62, %v1224_v46  ;;  %v1216_v52 = vadd.f32 %v1215_v49, %v1082_v28  ;;  %3298 = vmatprep.mubr.msk.bf16.mxu1 %vm489_vm1, %v1285_v45  ;;  %v1275_v59 = vmax.f32 %v1259_v50, 0.0  ;;  %v2886_v28 = vld [vmem:[%s4200_s3 + $0x5] ss:$0 sm:$0xff] }
 0x42c   : > { %v3288_v54 = vpop.f32.mrf.mxu0  ;;  %3299 = vmatmul.mubr.msk.bf16.gmra.mxu1 %vm489_vm1, %v1286_v48 }
 0x42d   : > { %v1260_v55 = vadd.f32 %v3826_v62, %v1216_v52  ;;  %v1278_v56 = vmax.f32 %v1262_v51, 0.0  ;;  %v1237_v0 = vadd.f32 %v3288_v54, %v3268_v37 }
 0x42e   : > { %v1228_v58 = vpop.f32.mrf.mxu0 }
 0x42f   : > { %v1276_v60 = vmax.f32 %v1260_v55, 0.0  ;;  %v1229_v61 = vadd.f32 %v1228_v58, %v1095_v47  ;;  %v1288_v4 = vpack.c.bf16 %v1278_v56, %v1277_v63  ;;  %v1265_v11 = vadd.f32 %v3826_v62, %v1237_v0 }
 0x430   : > { %v3289_v1 = vpop.f32.mrf.mxu0 }
 0x431   : > { %v1287_v2 = vpack.c.bf16 %v1276_v60, %v1275_v59  ;;  %v1240_v3 = vadd.f32 %v3289_v1, %v3269_v57  ;;  %v1263_v7 = vadd.f32 %v3826_v62, %v1229_v61  ;;  %v1281_v18 = vmax.f32 %v1265_v11, 0.0 }
 0x432   : > { %v1231_v6 = vpop.f32.mrf.mxu0 }
 0x433   : > { %v1266_v9 = vadd.f32 %v3826_v62, %v1240_v3  ;;  %v1232_v10 = vadd.f32 %v1231_v6, %v1098_v5  ;;  %3302 = vmatprep.mubr.msk.bf16.mxu1 %vm489_vm1, %v1287_v2  ;;  %v1279_v16 = vmax.f32 %v1263_v7, 0.0 }
 0x434   : > { %3303 = vmatmul.mubr.msk.bf16.gmra.mxu1 %vm489_vm1, %v1288_v4 }
 0x435   : > { %v1264_v12 = vadd.f32 %v3826_v62, %v1232_v10  ;;  %v1282_v15 = vmax.f32 %v1266_v9, 0.0 }
 0x437   : > { %v1280_v17 = vmax.f32 %v1264_v12, 0.0  ;;  %v1290_v22 = vpack.c.bf16 %v1282_v15, %v1281_v18 }
 0x439   : > { %v1289_v21 = vpack.c.bf16 %v1280_v17, %v1279_v16 }
 0x43b   : > { %3306 = vmatprep.mubr.msk.bf16.mxu1 %vm489_vm1, %v1289_v21 }
 0x43c   : > { %3307 = vmatmul.mubr.msk.bf16.gmra.mxu1 %vm489_vm1, %v1290_v22 }
 0x4e4   : > { %v3296_v62 = vpop.f32.mrf.mxu1 }
 0x4e5   : > { %v1383_v34 = vadd.f32 %v3296_v62, %v2886_v28 }
 0x4e6   : > { %v1374_v27 = vpop.f32.mrf.mxu1 }
 0x4e7   : > { %v1375_v31 = vadd.f32 %v2886_v28, %v1374_v27  ;;  %v1439_v40 = vmax.f32 %v1383_v34, 0.0  ;;  %v3471_v27 = vld [vmem:[%s4201_s4 + $0x8] sm:$0xff]  }
 0x4e8   : > { %v3297_v30 = vpop.f32.mrf.mxu1  ;;  %3350 = vmatprep.subr.bf16.mxu0 %v3471_v27 }
 0x4e9   : > { %v1386_v32 = vadd.f32 %v3297_v30, %v2886_v28  ;;  %v1437_v38 = vmax.f32 %v1375_v31, 0.0  ;;  %v3472_v30 = vld [vmem:[%s4201_s4] sm:$0xff]  }
 0x4ea   : > { %v1377_v35 = vpop.f32.mrf.mxu1 }
 0x4eb   : > { %v1378_v33 = vadd.f32 %v2886_v28, %v1377_v35  ;;  %v1440_v36 = vmax.f32 %v1386_v32, 0.0  ;;  %v2902_v32 = vld [vmem:[%s4200_s3 + $0x6] ss:$0 sm:$0xff] }
 0x4ec   : > { %v3300_v37 = vpop.f32.mrf.mxu1 }
 0x4ed   : > { %v1438_v39 = vmax.f32 %v1378_v33, 0.0  ;;  %v1454_v42 = vpack.c.bf16 %v1440_v36, %v1439_v40  ;;  %v1399_v48 = vadd.f32 %v3300_v37, %v2886_v28 }
 0x4ee   : > { %v1390_v41 = vpop.f32.mrf.mxu1 }
 0x4ef   : > { %v1453_v43 = vpack.c.bf16 %v1438_v39, %v1437_v38  ;;  %v1391_v45 = vadd.f32 %v2886_v28, %v1390_v41  ;;  %v1443_v54 = vmax.f32 %v1399_v48, 0.0 }
 0x4f0   : > { %v3301_v44 = vpop.f32.mrf.mxu1 }
 0x4f1   : > { %v1402_v46 = vadd.f32 %v3301_v44, %v2886_v28  ;;  %3314 = vmatprep.mubr.msk.bf16.mxu0 %vm489_vm1, %v1453_v43  ;;  %v1441_v52 = vmax.f32 %v1391_v45, 0.0 }
 0x4f2   : > { %v1393_v47 = vpop.f32.mrf.mxu1  ;;  %3315 = vmatmul.mubr.msk.bf16.vlgmr.msra.gmra.mxu0 %vm489_vm1, %v1454_v42 }
 0x4f3   : > { %v1394_v49 = vadd.f32 %v2886_v28, %v1393_v47  ;;  %v1444_v50 = vmax.f32 %v1402_v46, 0.0  ;;  %3351 = vmatpush3.bf16.msra.mxu0 %v3471_v27 }
 0x4f4   : > { %v3304_v51 = vpop.f32.mrf.mxu1  ;;  %3352 = vmatprep.subr.bf16.mxu0 %v3472_v30 }
 0x4f5   : > { %v1442_v53 = vmax.f32 %v1394_v49, 0.0  ;;  %v1456_v57 = vpack.c.bf16 %v1444_v50, %v1443_v54  ;;  %v1415_v61 = vadd.f32 %v3304_v51, %v2886_v28 }
 0x4f6   : > { %v1406_v55 = vpop.f32.mrf.mxu1 }
 0x4f7   : > { %v1455_v56 = vpack.c.bf16 %v1442_v53, %v1441_v52  ;;  %v1407_v59 = vadd.f32 %v2886_v28, %v1406_v55  ;;  %v1447_v5 = vmax.f32 %v1415_v61, 0.0  ;;  %3353 = vmatpush3.bf16.msra.mxu0 %v3472_v30 }
 0x4f8   : > { %v3305_v58 = vpop.f32.mrf.mxu1 }
 0x4f9   : > { %v1418_v60 = vadd.f32 %v3305_v58, %v2886_v28  ;;  %3318 = vmatprep.mubr.msk.bf16.mxu0 %vm489_vm1, %v1455_v56  ;;  %v1445_v3 = vmax.f32 %v1407_v59, 0.0 }
 0x4fa   : > { %v1409_v63 = vpop.f32.mrf.mxu1  ;;  %3319 = vmatmul.mubr.msk.bf16.gmra.mxu0 %vm489_vm1, %v1456_v57 }
 0x4fb   : > { %v1410_v0 = vadd.f32 %v2886_v28, %v1409_v63  ;;  %v1448_v1 = vmax.f32 %v1418_v60, 0.0 }
 0x4fc   : > { %v3308_v2 = vpop.f32.mrf.mxu1 }
 0x4fd   : > { %v1446_v4 = vmax.f32 %v1410_v0, 0.0  ;;  %v1458_v9 = vpack.c.bf16 %v1448_v1, %v1447_v5  ;;  %v1431_v15 = vadd.f32 %v3308_v2, %v2886_v28 }
 0x4fe   : > { %v1422_v6 = vpop.f32.mrf.mxu1 }
 0x4ff   : > { %v1457_v7 = vpack.c.bf16 %v1446_v4, %v1445_v3  ;;  %v1423_v11 = vadd.f32 %v2886_v28, %v1422_v6  ;;  %v1451_v23 = vmax.f32 %v1431_v15, 0.0 }
 0x500   : > { %v3309_v10 = vpop.f32.mrf.mxu1 }
 0x501   : > { %v1434_v12 = vadd.f32 %v3309_v10, %v2886_v28  ;;  %3322 = vmatprep.mubr.msk.bf16.mxu0 %vm489_vm1, %v1457_v7  ;;  %v1449_v21 = vmax.f32 %v1423_v11, 0.0 }
 0x502   : > { %v1425_v16 = vpop.f32.mrf.mxu1  ;;  %3323 = vmatmul.mubr.msk.bf16.gmra.mxu0 %vm489_vm1, %v1458_v9 }
 0x503   : > { %v1426_v17 = vadd.f32 %v2886_v28, %v1425_v16  ;;  %v1452_v18 = vmax.f32 %v1434_v12, 0.0 }
 0x505   : > { %v1450_v22 = vmax.f32 %v1426_v17, 0.0  ;;  %v1460_v62 = vpack.c.bf16 %v1452_v18, %v1451_v23 }
 0x507   : > { %v1459_v24 = vpack.c.bf16 %v1450_v22, %v1449_v21 }
 0x509   : > { %3326 = vmatprep.mubr.msk.bf16.mxu0 %vm489_vm1, %v1459_v24 }
 0x50a   : > { %3327 = vmatmul.mubr.msk.bf16.gmra.mxu0 %vm489_vm1, %v1460_v62 }
 0x5b2   : > { %v3316_v28 = vpop.f32.mrf.mxu0 }
 0x5b3   : > { %v1553_v36 = vadd.f32 %v3316_v28, %v2902_v32 }
 0x5b4   : > { %v1544_v31 = vpop.f32.mrf.mxu0 }
 0x5b5   : > { %v1545_v35 = vadd.f32 %v2902_v32, %v1544_v31  ;;  %v1609_v42 = vmax.f32 %v1553_v36, 0.0  ;;  %v3473_v31 = vld [vmem:[%s4198_s1 + $0x58] sm:$0xff]  }
 0x5b6   : > { %v3317_v34 = vpop.f32.mrf.mxu0  ;;  %3370 = vmatprep.subr.bf16.mxu1 %v3473_v31  ;;  %v3584_v36 = vld [vmem:[%s3668_s13 + $0x38] sm:$0xff] }
 0x5b7   : > { %v1556_v33 = vadd.f32 %v3317_v34, %v2902_v32  ;;  %v1607_v41 = vmax.f32 %v1545_v35, 0.0  ;;  %v3475_v34 = vld [vmem:[%s4198_s1 + $0x50] sm:$0xff]   ;;  %v3478_v35 = vld [vmem:[%s4198_s1 + $0x40] sm:$0xff]  }
 0x5b8   : > { %v1547_v37 = vpop.f32.mrf.mxu0 }
 0x5b9   : > { %v1548_v38 = vadd.f32 %v2902_v32, %v1547_v37  ;;  %v1610_v39 = vmax.f32 %v1556_v33, 0.0  ;;  %v3583_v33 = vld [vmem:[%s3668_s13 + $0x30] sm:$0xff]  ;;  %v3585_v37 = vld [vmem:[%s3668_s13 + $0x40] sm:$0xff] }
 0x5ba   : > { %v3320_v40 = vpop.f32.mrf.mxu0 }
 0x5bb   : > { %v1608_v43 = vmax.f32 %v1548_v38, 0.0  ;;  %v1624_v46 = vpack.c.bf16 %v1610_v39, %v1609_v42  ;;  %v1569_v50 = vadd.f32 %v3320_v40, %v2902_v32  ;;  %v3586_v38 = vld [vmem:[%s3668_s13 + $0x48] sm:$0xff]  ;;  %v3587_v39 = vld [vmem:[%s3668_s13 + $0x50] sm:$0xff]  ;;  %v3588_v40 = vld [vmem:[%s3668_s13 + $0x58] sm:$0xff] }
 0x5bc   : > { %v1560_v44 = vpop.f32.mrf.mxu0  ;;  %v3591_v42 = vld [vmem:[%s3668_s13 + $0x70] sm:$0xff] }
 0x5bd   : > { %v1623_v45 = vpack.c.bf16 %v1608_v43, %v1607_v41  ;;  %v1561_v47 = vadd.f32 %v2902_v32, %v1560_v44  ;;  %v1613_v57 = vmax.f32 %v1569_v50, 0.0  ;;  %v3589_v41 = vld [vmem:[%s3668_s13 + $0x60] sm:$0xff]  ;;  %v3590_v43 = vld [vmem:[%s3668_s13 + $0x68] sm:$0xff]  ;;  %v3592_v44 = vld [vmem:[%s3668_s13 + $0x78] sm:$0xff] }
 0x5be   : > { %v3321_v48 = vpop.f32.mrf.mxu0 }
 0x5bf   : > { %v1572_v49 = vadd.f32 %v3321_v48, %v2902_v32  ;;  %3334 = vmatprep.mubr.msk.bf16.mxu1 %vm489_vm1, %v1623_v45  ;;  %v1611_v55 = vmax.f32 %v1561_v47, 0.0  ;;  %v2918_v48 = vld [vmem:[%s4200_s3 + $0x7] ss:$0 sm:$0xff] }
 0x5c0   : > { %v1563_v51 = vpop.f32.mrf.mxu0  ;;  %3335 = vmatmul.mubr.msk.bf16.vlgmr.msra.gmra.mxu1 %vm489_vm1, %v1624_v46 }
 0x5c1   : > { %v1564_v52 = vadd.f32 %v2902_v32, %v1563_v51  ;;  %v1614_v53 = vmax.f32 %v1572_v49, 0.0  ;;  %3371 = vmatpush3.bf16.msra.mxu1 %v3473_v31 }
 0x5c2   : > { %v3324_v54 = vpop.f32.mrf.mxu0  ;;  %3372 = vmatprep.subr.bf16.mxu1 %v3475_v34 }
 0x5c3   : > { %v1612_v56 = vmax.f32 %v1564_v52, 0.0  ;;  %v1626_v60 = vpack.c.bf16 %v1614_v53, %v1613_v57  ;;  %v1585_v1 = vadd.f32 %v3324_v54, %v2902_v32 }
 0x5c4   : > { %v1576_v58 = vpop.f32.mrf.mxu0 }
 0x5c5   : > { %v1625_v59 = vpack.c.bf16 %v1612_v56, %v1611_v55  ;;  %v1577_v63 = vadd.f32 %v2902_v32, %v1576_v58  ;;  %v1617_v9 = vmax.f32 %v1585_v1, 0.0  ;;  %3373 = vmatpush3.bf16.msra.mxu1 %v3475_v34 }
 0x5c6   : > { %v3325_v61 = vpop.f32.mrf.mxu0 }
 0x5c7   : > { %v1588_v0 = vadd.f32 %v3325_v61, %v2902_v32  ;;  %3338 = vmatprep.mubr.msk.bf16.mxu1 %vm489_vm1, %v1625_v59  ;;  %v1615_v6 = vmax.f32 %v1577_v63, 0.0 }
 0x5c8   : > { %v1579_v2 = vpop.f32.mrf.mxu0  ;;  %3339 = vmatmul.mubr.msk.bf16.gmra.mxu1 %vm489_vm1, %v1626_v60 }
 0x5c9   : > { %v1580_v3 = vadd.f32 %v2902_v32, %v1579_v2  ;;  %v1618_v4 = vmax.f32 %v1588_v0, 0.0  ;;  %v3477_v0 = vld [vmem:[%s4199_s2 + $0x70] sm:$0xff]  }
 0x5ca   : > { %v3328_v5 = vpop.f32.mrf.mxu0 }
 0x5cb   : > { %v1616_v7 = vmax.f32 %v1580_v3, 0.0  ;;  %v1628_v12 = vpack.c.bf16 %v1618_v4, %v1617_v9  ;;  %v1601_v18 = vadd.f32 %v3328_v5, %v2902_v32 }
 0x5cc   : > { %v1592_v10 = vpop.f32.mrf.mxu0 }
 0x5cd   : > { %v1627_v11 = vpack.c.bf16 %v1616_v7, %v1615_v6  ;;  %v1593_v16 = vadd.f32 %v2902_v32, %v1592_v10  ;;  %v1621_v27 = vmax.f32 %v1601_v18, 0.0 }
 0x5ce   : > { %v3329_v15 = vpop.f32.mrf.mxu0 }
 0x5cf   : > { %v1604_v17 = vadd.f32 %v3329_v15, %v2902_v32  ;;  %3342 = vmatprep.mubr.msk.bf16.mxu1 %vm489_vm1, %v1627_v11  ;;  %v1619_v24 = vmax.f32 %v1593_v16, 0.0 }
 0x5d0   : > { %v1595_v21 = vpop.f32.mrf.mxu0  ;;  %3343 = vmatmul.mubr.msk.bf16.gmra.mxu1 %vm489_vm1, %v1628_v12 }
 0x5d1   : > { %v1596_v22 = vadd.f32 %v2902_v32, %v1595_v21  ;;  %v1622_v23 = vmax.f32 %v1604_v17, 0.0  ;;  %v3894_v32 = vld [vmem:[%s4199_s2 + $0x78] sm:$0xff]  }
 0x5d2   : > { %3394 = vmatprep.subr.bf16.mxu0 %v3894_v32 }
 0x5d3   : > { %v1620_v62 = vmax.f32 %v1596_v22, 0.0  ;;  %v1630_v28 = vpack.c.bf16 %v1622_v23, %v1621_v27 }
 0x5d5   : > { %v1629_v30 = vpack.c.bf16 %v1620_v62, %v1619_v24 }
 0x5d7   : > { %3346 = vmatprep.mubr.msk.bf16.mxu1 %vm489_vm1, %v1629_v30 }
 0x5d8   : > { %3347 = vmatmul.mubr.msk.bf16.gmra.mxu1 %vm489_vm1, %v1630_v28 }
 0x5d9   : > { %3378 = vmatprep.mubr.msk.bf16.mxu1 %vm319_vm0, %v3675_v8  ;;  %v3476_v8 = vld [vmem:[%s4198_s1 + $0x48] sm:$0xff]  }
 0x5da   : > { %3374 = vmatprep.subr.bf16.mxu1 %v3476_v8 }
 0x5db   : > { %3375 = vmatpush3.bf16.msra.mxu1 %v3476_v8 }
 0x5dc   : > { %3376 = vmatprep.subr.bf16.mxu1 %v3478_v35 }
 0x5df   : > { %3377 = vmatpush3.bf16.msra.mxu1 %v3478_v35 }
 0x5e2   : > { %3379 = vmatmul.mubr.msk.bf16.vlgmr.msra.gmra.mxu1 %vm319_vm0, %v3683_v13  ;;  %v3601_v13 = vmov 48  }
 0x5e3   : > { %3382 = vmatprep.mubr.msk.bf16.mxu1 %vm319_vm0, %v3685_v14  ;;  %3447 = vset.pattern.permute.xlu0 %v3601_v13  ;;  %v3577_v14 = vld [vmem:[%s3668_s13] sm:$0xff] }
 0x5e4   : > { %3448 = vset.pattern.permute.xlu1 %v3601_v13  ;;  %1979 = vperm.xlu0 %3447, %v3577_v14  }
 0x5ea   : > { %3383 = vmatmul.mubr.msk.bf16.gmra.mxu1 %vm319_vm0, %v3695_v19  ;;  %v3578_v19 = vld [vmem:[%s3668_s13 + $0x10] sm:$0xff] }
 0x5eb   : > { %3386 = vmatprep.mubr.msk.bf16.mxu1 %vm319_vm0, %v3697_v20  ;;  %1989 = vperm.xlu1 %3448, %v3578_v19   ;;  %v3579_v20 = vld [vmem:[%s3668_s13 + $0x8] sm:$0xff] }
 0x5ec   : > { %1984 = vperm.xlu0 %3447, %v3579_v20  }
 0x5f2   : > { %3387 = vmatmul.mubr.msk.bf16.gmra.mxu1 %vm319_vm0, %v3707_v25  ;;  %v3580_v25 = vld [vmem:[%s3668_s13 + $0x18] sm:$0xff] }
 0x5f3   : > { %3390 = vmatprep.mubr.msk.bf16.mxu1 %vm319_vm0, %v3709_v26  ;;  %1994 = vperm.xlu1 %3448, %v3580_v25   ;;  %v3581_v26 = vld [vmem:[%s3668_s13 + $0x20] sm:$0xff] }
 0x5f4   : > { %1999 = vperm.xlu0 %3447, %v3581_v26  }
 0x5f8   : > { %2009 = vperm.xlu0 %3447, %v3583_v33  }
 0x5fa   : > { %3391 = vmatmul.mubr.msk.bf16.gmra.mxu1 %vm319_vm0, %v3717_v29  ;;  %v3582_v29 = vld [vmem:[%s3668_s13 + $0x28] sm:$0xff] }
 0x5fb   : > { %2004 = vperm.xlu1 %3448, %v3582_v29  }
 0x5fc   : > { %2019 = vperm.xlu0 %3447, %v3585_v37  }
 0x5ff   : > { %2014 = vperm.xlu1 %3448, %v3584_v36  }
 0x600   : > { %2029 = vperm.xlu0 %3447, %v3587_v39   ;;  %v3479_v39 = vld [vmem:[%s4201_s4 + $0x18] sm:$0xff]  }
 0x601   : > { %3414 = vmatprep.subr.bf16.mxu1 %v3479_v39 }
 0x602   : > { %3415 = vmatpush3.bf16.msra.mxu1 %v3479_v39 }
 0x603   : > { %2024 = vperm.xlu1 %3448, %v3586_v38  }
 0x604   : > { %2039 = vperm.xlu0 %3447, %v3589_v41  }
 0x607   : > { %2034 = vperm.xlu1 %3448, %v3588_v40   ;;  %v3480_v40 = vld [vmem:[%s4201_s4 + $0x10] sm:$0xff]  }
 0x608   : > { %2049 = vperm.xlu0 %3447, %v3591_v42   ;;  %3416 = vmatprep.subr.bf16.mxu1 %v3480_v40 }
 0x609   : > { %3417 = vmatpush3.bf16.msra.mxu1 %v3480_v40 }
 0x60b   : > { %2044 = vperm.xlu1 %3448, %v3590_v43  }
 0x60f   : > { %2054 = vperm.xlu1 %3448, %v3592_v44  }
 0x680   : > { %v3336_v45 = vpop.f32.mrf.mxu1 }
 0x681   : > { %v1723_v51 = vadd.f32 %v3336_v45, %v2918_v48 }
 0x682   : > { %v1714_v46 = vpop.f32.mrf.mxu1 }
 0x683   : > { %v1715_v49 = vadd.f32 %v2918_v48, %v1714_v46  ;;  %v1779_v58 = vmax.f32 %v1723_v51, 0.0 }
 0x684   : > { %v3337_v47 = vpop.f32.mrf.mxu1 }
 0x685   : > { %v1726_v50 = vadd.f32 %v3337_v47, %v2918_v48  ;;  %v1777_v56 = vmax.f32 %v1715_v49, 0.0 }
 0x686   : > { %v1717_v52 = vpop.f32.mrf.mxu1 }
 0x687   : > { %v1718_v53 = vadd.f32 %v2918_v48, %v1717_v52  ;;  %v1780_v54 = vmax.f32 %v1726_v50, 0.0 }
 0x688   : > { %v3340_v55 = vpop.f32.mrf.mxu1 }
 0x689   : > { %v1778_v57 = vmax.f32 %v1718_v53, 0.0  ;;  %v1794_v61 = vpack.c.bf16 %v1780_v54, %v1779_v58  ;;  %v1739_v3 = vadd.f32 %v3340_v55, %v2918_v48 }
 0x68a   : > { %v1730_v59 = vpop.f32.mrf.mxu1 }
 0x68b   : > { %v1793_v60 = vpack.c.bf16 %v1778_v57, %v1777_v56  ;;  %v1731_v1 = vadd.f32 %v2918_v48, %v1730_v59  ;;  %v1783_v11 = vmax.f32 %v1739_v3, 0.0 }
 0x68c   : > { %v3341_v63 = vpop.f32.mrf.mxu1 }
 0x68d   : > { %v1742_v2 = vadd.f32 %v3341_v63, %v2918_v48  ;;  %3354 = vmatprep.mubr.msk.bf16.mxu0 %vm489_vm1, %v1793_v60  ;;  %v1781_v9 = vmax.f32 %v1731_v1, 0.0 }
 0x68e   : > { %v1733_v4 = vpop.f32.mrf.mxu1  ;;  %3355 = vmatmul.mubr.msk.bf16.vlgmr.msra.gmra.mxu0 %vm489_vm1, %v1794_v61 }
 0x68f   : > { %v1734_v5 = vadd.f32 %v2918_v48, %v1733_v4  ;;  %3395 = vmatpush3.bf16.msra.mxu0 %v3894_v32  ;;  %v1784_v6 = vmax.f32 %v1742_v2, 0.0 }
 0x690   : > { %v3344_v7 = vpop.f32.mrf.mxu1  ;;  %3396 = vmatprep.subr.bf16.mxu0 %v3477_v0 }
 0x691   : > { %v1782_v10 = vmax.f32 %v1734_v5, 0.0  ;;  %v1796_v16 = vpack.c.bf16 %v1784_v6, %v1783_v11  ;;  %v1755_v22 = vadd.f32 %v3344_v7, %v2918_v48 }
 0x692   : > { %v1746_v12 = vpop.f32.mrf.mxu1 }
 0x693   : > { %v1795_v15 = vpack.c.bf16 %v1782_v10, %v1781_v9  ;;  %3397 = vmatpush3.bf16.msra.mxu0 %v3477_v0  ;;  %v1747_v18 = vadd.f32 %v2918_v48, %v1746_v12  ;;  %v1787_v31 = vmax.f32 %v1755_v22, 0.0  ;;  %v4000_v9 = vld [vmem:[%s4200_s3 + $0x8] ss:$0 sm:$0xff] }
 0x694   : > { %v3345_v17 = vpop.f32.mrf.mxu1 }
 0x695   : > { %v1758_v21 = vadd.f32 %v3345_v17, %v2918_v48  ;;  %3358 = vmatprep.mubr.msk.bf16.mxu0 %vm489_vm1, %v1795_v15  ;;  %v1785_v30 = vmax.f32 %v1747_v18, 0.0 }
 0x696   : > { %v1749_v23 = vpop.f32.mrf.mxu1  ;;  %3359 = vmatmul.mubr.msk.bf16.gmra.mxu0 %vm489_vm1, %v1796_v16 }
 0x697   : > { %v1750_v24 = vadd.f32 %v2918_v48, %v1749_v23  ;;  %v1788_v62 = vmax.f32 %v1758_v21, 0.0 }
 0x698   : > { %v3348_v27 = vpop.f32.mrf.mxu1 }
 0x699   : > { %v1786_v28 = vmax.f32 %v1750_v24, 0.0  ;;  %v1798_v8 = vpack.c.bf16 %v1788_v62, %v1787_v31  ;;  %v1771_v19 = vadd.f32 %v3348_v27, %v2918_v48 }
 0x69a   : > { %v1762_v32 = vpop.f32.mrf.mxu1 }
 0x69b   : > { %v1797_v34 = vpack.c.bf16 %v1786_v28, %v1785_v30  ;;  %v1763_v13 = vadd.f32 %v2918_v48, %v1762_v32  ;;  %v1791_v36 = vmax.f32 %v1771_v19, 0.0 }
 0x69c   : > { %v3349_v35 = vpop.f32.mrf.mxu1 }
 0x69d   : > { %v1774_v14 = vadd.f32 %v3349_v35, %v2918_v48  ;;  %3362 = vmatprep.mubr.msk.bf16.mxu0 %vm489_vm1, %v1797_v34  ;;  %v1789_v29 = vmax.f32 %v1763_v13, 0.0 }
 0x69e   : > { %v1765_v20 = vpop.f32.mrf.mxu1  ;;  %3363 = vmatmul.mubr.msk.bf16.gmra.mxu0 %vm489_vm1, %v1798_v8 }
 0x69f   : > { %v1766_v25 = vadd.f32 %v2918_v48, %v1765_v20  ;;  %v1792_v26 = vmax.f32 %v1774_v14, 0.0 }
 0x6a1   : > { %v1790_v33 = vmax.f32 %v1766_v25, 0.0  ;;  %v1800_v38 = vpack.c.bf16 %v1792_v26, %v1791_v36 }
 0x6a2   : > { %v3380_v42 = vpop.f32.mrf.mxu1 }
 0x6a3   : > { %v1799_v37 = vpack.c.bf16 %v1790_v33, %v1789_v29 }
 0x6a4   : > { %v2193_v46 = vpop.f32.mrf.mxu1 }
 0x6a5   : > { %3366 = vmatprep.mubr.msk.bf16.mxu0 %vm489_vm1, %v1799_v37 }
 0x6a6   : > { %3367 = vmatmul.mubr.msk.bf16.gmra.mxu0 %vm489_vm1, %v1800_v38  ;;  %v3381_v49 = vpop.f32.mrf.mxu1 }
 0x6a7   : > { %3398 = vmatprep.mubr.msk.bf16.mxu0 %vm489_vm1, %v1793_v60 }
 0x6a8   : > { %v2196_v52 = vpop.f32.mrf.mxu1 }
 0x6aa   : > { %v3384_v55 = vpop.f32.mrf.mxu1 }
 0x6ac   : > { %v2209_v58 = vpop.f32.mrf.mxu1 }
 0x6ae   : > { %3399 = vmatmul.mubr.msk.bf16.vlgmr.msra.gmra.mxu0 %vm489_vm1, %v1794_v61  ;;  %v3385_v61 = vpop.f32.mrf.mxu1 }
 0x6af   : > { %3402 = vmatprep.mubr.msk.bf16.mxu0 %vm489_vm1, %v1795_v15 }
 0x6b0   : > { %v2212_v1 = vpop.f32.mrf.mxu1 }
 0x6b2   : > { %v3388_v4 = vpop.f32.mrf.mxu1 }
 0x6b4   : > { %v2225_v12 = vpop.f32.mrf.mxu1 }
 0x6b6   : > { %3403 = vmatmul.mubr.msk.bf16.gmra.mxu0 %vm489_vm1, %v1796_v16  ;;  %v3389_v62 = vpop.f32.mrf.mxu1 }
 0x6b7   : > { %3406 = vmatprep.mubr.msk.bf16.mxu0 %vm489_vm1, %v1797_v34 }
 0x6b8   : > { %v2228_v19 = vpop.f32.mrf.mxu1 }
 0x6be   : > { %3407 = vmatmul.mubr.msk.bf16.gmra.mxu0 %vm489_vm1, %v1798_v8 }
 0x6bf   : > { %3410 = vmatprep.mubr.msk.bf16.mxu0 %vm489_vm1, %v1799_v37 }
 0x6c6   : > { %3411 = vmatmul.mubr.msk.bf16.gmra.mxu0 %vm489_vm1, %v1800_v38  ;;  %v3392_v38 = vpop.f32.mrf.mxu1 }
 0x74e   : > { %v3965_v41 = vpop.f32.mrf.mxu0 }
 0x750   : > { %v3967_v43 = vpop.f32.mrf.mxu0 }
 0x752   : > { %v3969_v44 = vpop.f32.mrf.mxu0 }
 0x754   : > { %v3971_v45 = vpop.f32.mrf.mxu0 }
 0x756   : > { %v3973_v48 = vpop.f32.mrf.mxu0 }
 0x758   : > { %v3975_v47 = vpop.f32.mrf.mxu0 }
 0x75a   : > { %v3977_v50 = vpop.f32.mrf.mxu0 }
 0x75c   : > { %v3979_v51 = vpop.f32.mrf.mxu0 }
 0x75e   : > { %v3981_v53 = vpop.f32.mrf.mxu0 }
 0x760   : > { %v3983_v54 = vpop.f32.mrf.mxu0 }
 0x762   : > { %v3985_v56 = vpop.f32.mrf.mxu0 }
 0x764   : > { %v3987_v57 = vpop.f32.mrf.mxu0 }
 0x766   : > { %v3989_v59 = vpop.f32.mrf.mxu0 }
 0x768   : > { %v3991_v60 = vpop.f32.mrf.mxu0 }
 0x76a   : > { %v3993_v63 = vpop.f32.mrf.mxu0 }
 0x76c   : > { %v3995_v0 = vpop.f32.mrf.mxu0 }
 0x76e   : > { %v3400_v2 = vpop.f32.mrf.mxu0 }
 0x76f   : > { %v2311_v5 = vadd.f32 %v3400_v2, %v3380_v42  ;;  %v2241_v2 = vpop.f32.mrf.mxu1 }
 0x770   : > { %v2302_v3 = vpop.f32.mrf.mxu0 }
 0x771   : > { %v2303_v6 = vadd.f32 %v2302_v3, %v2193_v46  ;;  %v2375_v17 = vadd.f32 %v4000_v9, %v2311_v5 }
 0x772   : > { %v3401_v7 = vpop.f32.mrf.mxu0 }
 0x773   : > { %v2314_v10 = vadd.f32 %v3401_v7, %v3381_v49  ;;  %v2373_v15 = vadd.f32 %v4000_v9, %v2303_v6  ;;  %v2391_v31 = vmax.f32 %v2375_v17, 0.0 }
 0x774   : > { %v2305_v11 = vpop.f32.mrf.mxu0 }
 0x775   : > { %v2306_v16 = vadd.f32 %v2305_v11, %v2196_v52  ;;  %v2376_v18 = vadd.f32 %v4000_v9, %v2314_v10  ;;  %v2389_v27 = vmax.f32 %v2373_v15, 0.0  ;;  %v3393_v15 = vpop.f32.mrf.mxu1 }
 0x776   : > { %v3404_v21 = vpop.f32.mrf.mxu0 }
 0x777   : > { %v2374_v22 = vadd.f32 %v4000_v9, %v2306_v16  ;;  %v2392_v23 = vmax.f32 %v2376_v18, 0.0  ;;  %v2327_v32 = vadd.f32 %v3404_v21, %v3384_v55 }
 0x778   : > { %v2318_v24 = vpop.f32.mrf.mxu0 }
 0x779   : > { %v2390_v30 = vmax.f32 %v2374_v22, 0.0  ;;  %v2319_v28 = vadd.f32 %v2318_v24, %v2209_v58  ;;  %v2406_v13 = vpack.c.bf16 %v2392_v23, %v2391_v31  ;;  %v2379_v29 = vadd.f32 %v4000_v9, %v2327_v32 }
 0x77a   : > { %v3405_v34 = vpop.f32.mrf.mxu0 }
 0x77b   : > { %v2405_v8 = vpack.c.bf16 %v2390_v30, %v2389_v27  ;;  %v2330_v35 = vadd.f32 %v3405_v34, %v3385_v61  ;;  %v2377_v20 = vadd.f32 %v4000_v9, %v2319_v28  ;;  %v2395_v46 = vmax.f32 %v2379_v29, 0.0  ;;  %v2244_v28 = vpop.f32.mrf.mxu1 }
 0x77c   : > { %v2321_v14 = vpop.f32.mrf.mxu0 }
 0x77d   : > { %v2380_v25 = vadd.f32 %v4000_v9, %v2330_v35  ;;  %v2322_v26 = vadd.f32 %v2321_v14, %v2212_v1  ;;  %3418 = vmatprep.mubr.msk.bf16.mxu1 %vm489_vm1, %v2405_v8  ;;  %v2393_v40 = vmax.f32 %v2377_v20, 0.0 }
 0x77e   : > { %v3408_v33 = vpop.f32.mrf.mxu0  ;;  %3419 = vmatmul.mubr.msk.bf16.vlgmr.msra.gmra.mxu1 %vm489_vm1, %v2406_v13 }
 0x77f   : > { %v2378_v36 = vadd.f32 %v4000_v9, %v2322_v26  ;;  %v2396_v37 = vmax.f32 %v2380_v25, 0.0  ;;  %v2343_v49 = vadd.f32 %v3408_v33, %v3388_v4  ;;  %v1980_v33 = vpop.permute.xlu0 %1979 }
 0x780   : > { %v2334_v39 = vpop.f32.mrf.mxu0 }
 0x781   : > { %v2394_v42 = vmax.f32 %v2378_v36, 0.0  ;;  %v2335_v52 = vadd.f32 %v2334_v39, %v2225_v12  ;;  %v2408_v1 = vpack.c.bf16 %v2396_v37, %v2395_v46  ;;  %v2383_v10 = vadd.f32 %v4000_v9, %v2343_v49  ;;  %v4029_v36 = vld [vmem:[%s4202_s5] ss:$0 sm:$0xff] }
 0x782   : > { %v3409_v55 = vpop.f32.mrf.mxu0  ;;  %v1891_v37 = vadd.f32 %v3965_v41, %v4029_v36  ;;  %v1907_v41 = vadd.f32 %v3973_v48, %v4029_v36 }
 0x783   : > { %v2407_v58 = vpack.c.bf16 %v2394_v42, %v2393_v40  ;;  %v2346_v61 = vadd.f32 %v3409_v55, %v3389_v62  ;;  %v2381_v5 = vadd.f32 %v4000_v9, %v2335_v52  ;;  %v2399_v22 = vmax.f32 %v2383_v10, 0.0  ;;  %v1985_v39 = vpop.permute.xlu0 %1984 }
 0x784   : > { %v2337_v3 = vpop.f32.mrf.mxu0  ;;  %v1947_v40 = vmax.f32 %v1891_v37, 0.0  ;;  %v1894_v42 = vadd.f32 %v3969_v44, %v4029_v36  ;;  %v1886_v52 = vadd.f32 %v4029_v36, %v3971_v45  ;;  %v1951_v44 = vmax.f32 %v1907_v41, 0.0 }
 0x785   : > { %v2384_v6 = vadd.f32 %v4000_v9, %v2346_v61  ;;  %v2338_v7 = vadd.f32 %v2337_v3, %v2228_v19  ;;  %3422 = vmatprep.mubr.msk.bf16.mxu1 %vm489_vm1, %v2407_v58  ;;  %v2397_v17 = vmax.f32 %v2381_v5, 0.0 }
 0x786   : > { %v3412_v11 = vpop.f32.mrf.mxu0  ;;  %3423 = vmatmul.mubr.msk.bf16.gmra.mxu1 %vm489_vm1, %v2408_v1  ;;  %v1963_v55 = vsub.f32 0.0, %v1947_v40  ;;  %v1948_v58 = vmax.f32 %v1894_v42, 0.0 }
 0x787   : > { %v2382_v4 = vadd.f32 %v4000_v9, %v2338_v7  ;;  %v2400_v12 = vmax.f32 %v2384_v6, 0.0  ;;  %v2359_v23 = vadd.f32 %v3412_v11, %v3392_v38  ;;  %v1883_v38 = vadd.f32 %v4029_v36, %v3967_v43  ;;  %v2000_v61 = vpop.permute.xlu0 %1999 }
 0x788   : > { %v2350_v16 = vpop.f32.mrf.mxu0  ;;  %v1899_v43 = vadd.f32 %v4029_v36, %v3975_v47  ;;  %v1964_v3 = vsub.f32 0.0, %v1948_v58  ;;  %v1910_v7 = vadd.f32 %v3977_v50, %v4029_v36  ;;  %v1923_v47 = vadd.f32 %v3981_v53, %v4029_v36 }
 0x789   : > { %v2398_v18 = vmax.f32 %v2382_v4, 0.0  ;;  %v2351_v21 = vadd.f32 %v2350_v16, %v2241_v2  ;;  %v2410_v30 = vpack.c.bf16 %v2400_v12, %v2399_v22  ;;  %v2387_v35 = vadd.f32 %v4000_v9, %v2359_v23 }
 0x78a   : > { %v3413_v24 = vpop.f32.mrf.mxu0  ;;  %v1945_v46 = vmax.f32 %v1883_v38, 0.0  ;;  %v1946_v2 = vmax.f32 %v1886_v52, 0.0  ;;  %v1949_v4 = vmax.f32 %v1899_v43, 0.0  ;;  %v1902_v12 = vadd.f32 %v4029_v36, %v3979_v51 }
 0x78b   : > { %v2409_v62 = vpack.c.bf16 %v2398_v18, %v2397_v17  ;;  %v2362_v27 = vadd.f32 %v3413_v24, %v3393_v15  ;;  %v2385_v32 = vadd.f32 %v4000_v9, %v2351_v21  ;;  %v2403_v25 = vmax.f32 %v2387_v35, 0.0  ;;  %v2010_v45 = vpop.permute.xlu0 %2009 }
 0x78c   : > { %v2353_v31 = vpop.f32.mrf.mxu0  ;;  %v1961_v1 = vsub.f32 0.0, %v1945_v46  ;;  %v1962_v11 = vsub.f32 0.0, %v1946_v2  ;;  %v1967_v16 = vsub.f32 0.0, %v1951_v44  ;;  %v1952_v17 = vmax.f32 %v1910_v7, 0.0 }
 0x78d   : > { %v2388_v34 = vadd.f32 %v4000_v9, %v2362_v27  ;;  %v2354_v8 = vadd.f32 %v2353_v31, %v2244_v28  ;;  %3426 = vmatprep.mubr.msk.bf16.mxu1 %vm489_vm1, %v2409_v62  ;;  %v2401_v19 = vmax.f32 %v2385_v32, 0.0  ;;  %v1965_v23 = vsub.f32 0.0, %v1949_v4  ;;  %v4054_v62 = vld [vmem:[%s4202_s5 + $0x1] ss:$0 sm:$0xff] }
 0x78e   : > { %3427 = vmatmul.mubr.msk.bf16.gmra.mxu1 %vm489_vm1, %v2410_v30  ;;  %v2057_v10 = vmul.f32 %v1980_v33, %v1961_v1  ;;  %v2058_v22 = vmul.f32 %v1985_v39, %v1962_v11  ;;  %v1950_v24 = vmax.f32 %v1902_v12, 0.0  ;;  %v1915_v50 = vadd.f32 %v4029_v36, %v3983_v54 }
 0x78f   : > { %v2386_v13 = vadd.f32 %v4000_v9, %v2354_v8  ;;  %v2404_v14 = vmax.f32 %v2388_v34, 0.0  ;;  %v1990_v9 = vpop.permute.xlu1 %1989  ;;  %v2020_v27 = vpop.permute.xlu0 %2019  ;;  %v1968_v30 = vsub.f32 0.0, %v1952_v17  ;;  %v2063_v28 = vmul.f32 %v2010_v45, %v1967_v16 }
 0x790   : > { %v2059_v5 = vmul.f32 %v1990_v9, %v1963_v55  ;;  %v2073_v18 = vmul.f32 1.442695, %v2057_v10  ;;  %v1955_v31 = vmax.f32 %v1923_v47, 0.0  ;;  %v1926_v53 = vadd.f32 %v3985_v56, %v4029_v36 }
 0x791   : > { %v2402_v20 = vmax.f32 %v2386_v13, 0.0  ;;  %v2412_v29 = vpack.c.bf16 %v2404_v14, %v2403_v25  ;;  %v2075_v8 = vmul.f32 1.442695, %v2058_v22  ;;  %v2061_v54 = vmul.f32 %v2000_v61, %v1965_v23 }
 0x792   : > { %v2077_v48 = vmul.f32 1.442695, %v2059_v5  ;;  %v1966_v35 = vsub.f32 0.0, %v1950_v24  ;;  %v1953_v13 = vmax.f32 %v1915_v50, 0.0  ;;  %v1956_v37 = vmax.f32 %v1926_v53, 0.0 }
 0x793   : > { %v2411_v26 = vpack.c.bf16 %v2402_v20, %v2401_v19  ;;  %v1995_v49 = vpop.permute.xlu1 %1994  ;;  %v2030_v9 = vpop.permute.xlu0 %2029  ;;  %v2081_v40 = vmul.f32 1.442695, %v2061_v54  ;;  %v1918_v23 = vadd.f32 %v4029_v36, %v3987_v57 }
 0x794   : > { %v2060_v15 = vmul.f32 %v1995_v49, %v1964_v3  ;;  %3481 = vpow2.f32 %v2077_v48  ;;  %v1969_v46 = vsub.f32 0.0, %v1953_v13  ;;  %v1972_v61 = vsub.f32 0.0, %v1956_v37 }
 0x795   : > { %3430 = vmatprep.mubr.msk.bf16.mxu1 %vm489_vm1, %v2411_v26  ;;  %3483 = vpow2.f32 %v2073_v18  ;;  %v2085_v26 = vmul.f32 1.442695, %v2063_v28  ;;  %v1939_v28 = vadd.f32 %v3989_v59, %v4029_v36  ;;  %v1954_v54 = vmax.f32 %v1918_v23, 0.0 }
 0x796   : > { %3431 = vmatmul.mubr.msk.bf16.gmra.mxu1 %vm489_vm1, %v2412_v29  ;;  %v2079_v51 = vmul.f32 1.442695, %v2060_v15  ;;  %v1971_v29 = vsub.f32 0.0, %v1955_v31  ;;  %v2065_v44 = vmul.f32 %v2020_v27, %v1969_v46  ;;  %v1934_v23 = vadd.f32 %v4029_v36, %v3995_v0 }
 0x797   : > { %v2005_v6 = vpop.permute.xlu1 %2004 }
 0x798   : > { %3485 = vpow2.f32 %v2079_v51  ;;  %v2062_v42 = vmul.f32 %v2005_v6, %v1966_v35  ;;  %v2067_v41 = vmul.f32 %v2030_v9, %v1971_v29  ;;  %v2089_v17 = vmul.f32 1.442695, %v2065_v44 }
 0x799   : > { %v1931_v35 = vadd.f32 %v4029_v36, %v3991_v60 }
 0x79a   : > { %v2083_v5 = vmul.f32 1.442695, %v2062_v42  ;;  %v2093_v11 = vmul.f32 1.442695, %v2067_v41 }
 0x79b   : > { %v2015_v21 = vpop.permute.xlu1 %2014  ;;  %v1957_v42 = vmax.f32 %v1931_v35, 0.0  ;;  %v1958_v35 = vmax.f32 %v1934_v23, 0.0 }
 0x79c   : > { %v2064_v33 = vmul.f32 %v2015_v21, %v1968_v30 }
 0x79e   : > { %v2087_v58 = vmul.f32 1.442695, %v2064_v33  ;;  %v1959_v33 = vmax.f32 %v1939_v28, 0.0 }
 0x79f   : > { %v4059_v19 = vpop.permute.xlu1 %2024 }
 0x7a0   : > { %v1975_v41 = vsub.f32 0.0, %v1959_v33 }
 0x7a1   : > { %v4066_v45 = vpop.eup %3481 }
 0x7a2   : > { %v4069_v16 = vpop.eup %3483 }
 0x7a3   : > { %v2035_v2 = vpop.permute.xlu1 %2034 }
 0x7a4   : > { %v2068_v4 = vmul.f32 %v2035_v2, %v1972_v61 }
 0x7a5   : > { %v4072_v22 = vpop.eup %3485 }
 0x7a6   : > { %v2095_v24 = vmul.f32 1.442695, %v2068_v4  ;;  %v2687_v4 = vlaneseq }
 0x83e   : > { %v3420_v32 = vpop.f32.mrf.mxu1 }
 0x83f   : > { %v2505_v34 = vadd.f32 %v3420_v32, %v4054_v62 }
 0x840   : > { %v2496_v14 = vpop.f32.mrf.mxu1 }
 0x841   : > { %v2994_v20 = vmul.f32 -1.442695, %v2505_v34  ;;  %v2497_v25 = vadd.f32 %v4054_v62, %v2496_v14 }
 0x842   : > { %v3421_v56 = vpop.f32.mrf.mxu1 }
 0x843   : > { %3487 = vpow2.f32 %v2994_v20  ;;  %v2992_v38 = vmul.f32 -1.442695, %v2497_v25  ;;  %v2508_v39 = vadd.f32 %v3421_v56, %v4054_v62  ;;  %v2040_v20 = vpop.permute.xlu0 %2039 }
 0x844   : > { %3489 = vpow2.f32 %v2075_v8  ;;  %v2499_v49 = vpop.f32.mrf.mxu1 }
 0x845   : > { %3491 = vpow2.f32 %v2992_v38  ;;  %v2995_v52 = vmul.f32 -1.442695, %v2508_v39  ;;  %v2500_v55 = vadd.f32 %v4054_v62, %v2499_v49 }
 0x846   : > { %3493 = vpow2.f32 %v2085_v26  ;;  %v3424_v1 = vpop.f32.mrf.mxu1 }
 0x847   : > { %3495 = vpow2.f32 %v2995_v52  ;;  %v2993_v43 = vmul.f32 -1.442695, %v2500_v55  ;;  %v2521_v3 = vadd.f32 %v3424_v1, %v4054_v62  ;;  %v1942_v1 = vadd.f32 %v3993_v63, %v4029_v36 }
 0x848   : > { %3497 = vpow2.f32 %v2081_v40  ;;  %v2512_v6 = vpop.f32.mrf.mxu1  ;;  %v1970_v40 = vsub.f32 0.0, %v1954_v54  ;;  %v2107_v54 = vsub.f32 1.0, %v4066_v45 }
 0x849   : > { %3499 = vpow2.f32 %v2993_v43  ;;  %v2998_v7 = vmul.f32 -1.442695, %v2521_v3  ;;  %v2513_v10 = vadd.f32 %v4054_v62, %v2512_v6  ;;  %v2050_v3 = vpop.permute.xlu0 %2049 }
 0x84a   : > { %3501 = vpow2.f32 %v2087_v58  ;;  %v3425_v12 = vpop.f32.mrf.mxu1 }
 0x84b   : > { %3503 = vpow2.f32 %v2998_v7  ;;  %v2996_v48 = vmul.f32 -1.442695, %v2513_v10  ;;  %v2524_v15 = vadd.f32 %v3425_v12, %v4054_v62  ;;  %v2066_v10 = vmul.f32 %v4059_v19, %v1970_v40 }
 0x84c   : > { %3505 = vpow2.f32 %v2083_v5  ;;  %v2515_v47 = vpop.f32.mrf.mxu1 }
 0x84d   : > { %3507 = vpow2.f32 %v2996_v48  ;;  %v2999_v18 = vmul.f32 -1.442695, %v2524_v15  ;;  %v2516_v21 = vadd.f32 %v4054_v62, %v2515_v47 }
 0x84e   : > { %3509 = vpow2.f32 %v2093_v11  ;;  %v3428_v50 = vpop.f32.mrf.mxu1  ;;  %v1973_v11 = vsub.f32 0.0, %v1957_v42 }
 0x84f   : > { %3511 = vpow2.f32 %v2999_v18  ;;  %v2997_v51 = vmul.f32 -1.442695, %v2516_v21  ;;  %v2537_v27 = vadd.f32 %v3428_v50, %v4054_v62  ;;  %v1960_v18 = vmax.f32 %v1942_v1, 0.0  ;;  %v2045_v50 = vpop.permute.xlu1 %2044 }
 0x850   : > { %v3488_v30 = vpop.eup %3487  ;;  %3513 = vpow2.f32 %v2089_v17  ;;  %v2528_v31 = vpop.f32.mrf.mxu1  ;;  %v2071_v21 = vmul.f32 %v2050_v3, %v1975_v41 }
 0x851   : > { %v4079_v53 = vpop.eup %3489  ;;  %v2609_v32 = vadd.f32 1.0, %v3488_v30  ;;  %3515 = vpow2.f32 %v2997_v51  ;;  %v3002_v34 = vmul.f32 -1.442695, %v2537_v27  ;;  %v2529_v8 = vadd.f32 %v4054_v62, %v2528_v31 }
 0x852   : > { %v3492_v57 = vpop.eup %3491  ;;  %3517 = vpow2.f32 %v2095_v24  ;;  %v3429_v13 = vpop.f32.mrf.mxu1  ;;  %v2069_v31 = vmul.f32 %v2040_v20, %v1973_v11 }
 0x853   : > { %v4084_v14 = vpop.eup %3493  ;;  %3519 = vrcp.f32 %v2609_v32  ;;  %v2607_v59 = vadd.f32 1.0, %v3492_v57  ;;  %v3000_v25 = vmul.f32 -1.442695, %v2529_v8  ;;  %v2540_v26 = vadd.f32 %v3429_v13, %v4054_v62  ;;  %v2055_v45 = vpop.permute.xlu1 %2054 }
 0x854   : > { %v3496_v29 = vpop.eup %3495  ;;  %3521 = vpow2.f32 %v3002_v34  ;;  %v2531_v37 = vpop.f32.mrf.mxu1  ;;  %v4107_v32 = vand.u32 127, %v2687_v4  ;;  %v2091_v8 = vmul.f32 1.442695, %v2066_v10 }
 0x855   : > { %v4087_v56 = vpop.eup %3497  ;;  %3523 = vrcp.f32 %v2607_v59  ;;  %v2610_v9 = vadd.f32 1.0, %v3496_v29  ;;  %v3003_v38 = vmul.f32 -1.442695, %v2540_v26  ;;  %v2532_v60 = vadd.f32 %v4054_v62, %v2531_v37 }
 0x856   : > { %v3500_v39 = vpop.eup %3499  ;;  %3525 = vpow2.f32 %v3000_v25  ;;  %v3432_v46 = vpop.f32.mrf.mxu1  ;;  %v1976_v59 = vsub.f32 0.0, %v1960_v18  ;;  %v2097_v26 = vmul.f32 1.442695, %v2069_v31  ;;  %vm2689_vm2 = vcmp.eq.s32.totalorder %v4107_v32, 0 }
 0x857   : > { %v4090_v49 = vpop.eup %3501  ;;  %3527 = vrcp.f32 %v2610_v9  ;;  %v2608_v52 = vadd.f32 1.0, %v3500_v39  ;;  %v3001_v55 = vmul.f32 -1.442695, %v2532_v60  ;;  %v2553_v58 = vadd.f32 %v3432_v46, %v4054_v62 }
 0x858   : > { %v3504_v61 = vpop.eup %3503  ;;  %3529 = vpow2.f32 %v3003_v38  ;;  %v2544_v2 = vpop.f32.mrf.mxu1  ;;  %v2105_v60 = vsub.f32 1.0, %v4069_v16  ;;  %v1974_v39 = vsub.f32 0.0, %v1958_v35  ;;  %v2072_v41 = vmul.f32 %v2055_v45, %v1976_v59 }
 0x859   : > { %v4095_v43 = vpop.eup %3505  ;;  %3531 = vrcp.f32 %v2608_v52  ;;  %v2613_v5 = vadd.f32 1.0, %v3504_v61  ;;  %v3006_v44 = vmul.f32 -1.442695, %v2553_v58  ;;  %v2545_v6 = vadd.f32 %v4054_v62, %v2544_v2 }
 0x85a   : > { %v3508_v7 = vpop.eup %3507  ;;  %3533 = vpow2.f32 %v3001_v55  ;;  %v3433_v12 = vpop.f32.mrf.mxu1  ;;  %v2108_v61 = vsub.f32 1.0, %v4072_v22  ;;  %v2070_v10 = vmul.f32 %v2045_v50, %v1974_v39  ;;  %v2109_v50 = vsub.f32 1.0, %v4087_v56 }
 0x85b   : > { %v4099_v48 = vpop.eup %3509  ;;  %3535 = vrcp.f32 %v2613_v5  ;;  %v2611_v63 = vadd.f32 1.0, %v3508_v7  ;;  %v3004_v15 = vmul.f32 -1.442695, %v2545_v6  ;;  %v2556_v17 = vadd.f32 %v3433_v12, %v4054_v62 }
 0x85c   : > { %v3512_v47 = vpop.eup %3511  ;;  %3537 = vpow2.f32 %v3006_v44  ;;  %v2547_v24 = vpop.f32.mrf.mxu1  ;;  %v2106_v6 = vsub.f32 1.0, %v4079_v53 }
 0x85d   : > { %v4104_v19 = vpop.eup %3513  ;;  %3539 = vrcp.f32 %v2611_v63  ;;  %v2614_v51 = vadd.f32 1.0, %v3512_v47  ;;  %v3007_v27 = vmul.f32 -1.442695, %v2556_v17  ;;  %v2548_v30 = vadd.f32 %v4054_v62, %v2547_v24 }
 0x85e   : > { %v3516_v28 = vpop.eup %3515  ;;  %3541 = vpow2.f32 %v3004_v15  ;;  %v2101_v62 = vmul.f32 1.442695, %v2071_v21  ;;  %v2111_v15 = vsub.f32 1.0, %v4084_v14  ;;  %v2103_v47 = vmul.f32 1.442695, %v2072_v41 }
 0x85f   : > { %v4109_v34 = vpop.eup %3517  ;;  %3543 = vrcp.f32 %v2614_v51  ;;  %v2612_v0 = vadd.f32 1.0, %v3516_v28  ;;  %v3005_v36 = vmul.f32 -1.442695, %v2548_v30  ;;  %v2113_v39 = vsub.f32 1.0, %v4104_v19 }
 0x860   : > { %v3520_v57 = vpop.eup %3519  ;;  %3545 = vpow2.f32 %v3007_v27  ;;  %v2099_v27 = vmul.f32 1.442695, %v2070_v10 }
 0x861   : > { %v3522_v13 = vpop.eup %3521  ;;  %v2657_v25 = vmul.f32 1.002, %v3520_v57  ;;  %3547 = vrcp.f32 %v2612_v0  ;;  %v2112_v0 = vsub.f32 1.0, %v4090_v49  ;;  %v2110_v49 = vsub.f32 1.0, %v4095_v43 }
 0x862   : > { %v3524_v20 = vpop.eup %3523  ;;  %v2617_v29 = vadd.f32 1.0, %v3522_v13  ;;  %3549 = vpow2.f32 %v3005_v36 }
 0x863   : > { %v3526_v33 = vpop.eup %3525  ;;  %3551 = vpow2.f32 %v2091_v8  ;;  %v3010_v37 = vadd.f32 -0.001, %v2657_v25  ;;  %v2655_v9 = vmul.f32 1.002, %v3524_v20 }
 0x864   : > { %v3528_v38 = vpop.eup %3527  ;;  %3553 = vrcp.f32 %v2617_v29  ;;  %v2615_v40 = vadd.f32 1.0, %v3526_v33 }
 0x865   : > { %v3530_v42 = vpop.eup %3529  ;;  %3555 = vpow2.f32 %v2101_v62  ;;  %v2692_v46 = vsel %vm2689_vm2, %v2107_v54, %v3010_v37  ;;  %v3008_v52 = vadd.f32 -0.001, %v2655_v9  ;;  %v2658_v55 = vmul.f32 1.002, %v3528_v38 }
 0x866   : > { %v3532_v58 = vpop.eup %3531  ;;  %2709 = vst.msk [vmem:[%s4118_s10 + $0x10] sm:$0xff] %vm2706_vm3, %v2692_v46  ;;  %3557 = vrcp.f32 %v2615_v40  ;;  %v2618_v1 = vadd.f32 1.0, %v3530_v42  ;;  %v2115_v9 = vsub.f32 1.0, %v4099_v48 }
 0x867   : > { %v3534_v16 = vpop.eup %3533  ;;  %3559 = vpow2.f32 %v2097_v26  ;;  %v2690_v2 = vsel %vm2689_vm2, %v2105_v60, %v3008_v52  ;;  %v3011_v3 = vadd.f32 -0.001, %v2658_v55  ;;  %v2656_v5 = vmul.f32 1.002, %v3532_v58 }
 0x868   : > { %v3536_v44 = vpop.eup %3535  ;;  %2707 = vst.msk [vmem:[%s4118_s10] sm:$0xff] %vm2706_vm3, %v2690_v2  ;;  %3561 = vrcp.f32 %v2618_v1  ;;  %v2616_v22 = vadd.f32 1.0, %v3534_v16  ;;  %v2116_v55 = vsub.f32 1.0, %v4109_v34 }
 0x869   : > { %v3538_v7 = vpop.eup %3537  ;;  %v2693_v11 = vsel %vm2689_vm2, %v2108_v61, %v3011_v3  ;;  %v3009_v4 = vadd.f32 -0.001, %v2656_v5  ;;  %v2661_v12 = vmul.f32 1.002, %v3536_v44 }
 0x86a   : > { %v3540_v63 = vpop.eup %3539  ;;  %2710 = vst.msk [vmem:[%s4118_s10 + $0x18] sm:$0xff] %vm2706_vm3, %v2693_v11  ;;  %3563 = vrcp.f32 %v2616_v22  ;;  %v2621_v17 = vadd.f32 1.0, %v3538_v7 }
 0x86b   : > { %v3542_v53 = vpop.eup %3541  ;;  %v2691_v18 = vsel %vm2689_vm2, %v2106_v6, %v3009_v4  ;;  %v3014_v21 = vadd.f32 -0.001, %v2661_v12  ;;  %v2659_v23 = vmul.f32 1.002, %v3540_v63 }
 0x86c   : > { %v3544_v24 = vpop.eup %3543  ;;  %2708 = vst.msk [vmem:[%s4118_s10 + $0x8] sm:$0xff] %vm2706_vm3, %v2691_v18  ;;  %3565 = vrcp.f32 %v2621_v17  ;;  %v2619_v51 = vadd.f32 1.0, %v3542_v53 }
 0x86d   : > { %v3546_v14 = vpop.eup %3545  ;;  %v2696_v30 = vsel %vm2689_vm2, %v2111_v15, %v3014_v21  ;;  %v3012_v28 = vadd.f32 -0.001, %v2659_v23  ;;  %v2662_v31 = vmul.f32 1.002, %v3544_v24 }
 0x86e   : > { %v3548_v8 = vpop.eup %3547  ;;  %2713 = vst.msk [vmem:[%s4118_s10 + $0x30] sm:$0xff] %vm2706_vm3, %v2696_v30  ;;  %3567 = vrcp.f32 %v2619_v51  ;;  %v2622_v36 = vadd.f32 1.0, %v3546_v14 }
 0x86f   : > { %v3550_v56 = vpop.eup %3549  ;;  %3569 = vpow2.f32 %v2103_v47  ;;  %v2694_v57 = vsel %vm2689_vm2, %v2109_v50, %v3012_v28  ;;  %v3015_v54 = vadd.f32 -0.001, %v2662_v31  ;;  %v2660_v35 = vmul.f32 1.002, %v3548_v8 }
 0x870   : > { %v3552_v13 = vpop.eup %3551  ;;  %2711 = vst.msk [vmem:[%s4118_s10 + $0x20] sm:$0xff] %vm2706_vm3, %v2694_v57  ;;  %3571 = vrcp.f32 %v2622_v36  ;;  %v2620_v59 = vadd.f32 1.0, %v3550_v56 }
 0x871   : > { %v3554_v62 = vpop.eup %3553  ;;  %3573 = vpow2.f32 %v2099_v27  ;;  %v2697_v25 = vsel %vm2689_vm2, %v2112_v0, %v3015_v54  ;;  %v3013_v20 = vadd.f32 -0.001, %v2660_v35  ;;  %v2114_v19 = vsub.f32 1.0, %v3552_v13 }
 0x872   : > { %v3556_v26 = vpop.eup %3555  ;;  %2714 = vst.msk [vmem:[%s4118_s10 + $0x38] sm:$0xff] %vm2706_vm3, %v2697_v25  ;;  %v2665_v29 = vmul.f32 1.002, %v3554_v62  ;;  %3575 = vrcp.f32 %v2620_v59 }
 0x873   : > { %v3558_v33 = vpop.eup %3557  ;;  %v2695_v45 = vsel %vm2689_vm2, %v2110_v49, %v3013_v20  ;;  %v2119_v5 = vsub.f32 1.0, %v3556_v26 }
 0x874   : > { %v3560_v37 = vpop.eup %3559  ;;  %2712 = vst.msk [vmem:[%s4118_s10 + $0x28] sm:$0xff] %vm2706_vm3, %v2695_v45  ;;  %v3018_v43 = vadd.f32 -0.001, %v2665_v29  ;;  %v2663_v38 = vmul.f32 1.002, %v3558_v33 }
 0x875   : > { %v3562_v60 = vpop.eup %3561  ;;  %v2117_v11 = vsub.f32 1.0, %v3560_v37 }
 0x876   : > { %v2700_v40 = vsel %vm2689_vm2, %v2115_v9, %v3018_v43  ;;  %v3016_v42 = vadd.f32 -0.001, %v2663_v38  ;;  %v2666_v46 = vmul.f32 1.002, %v3562_v60 }
 0x877   : > { %v3564_v52 = vpop.eup %3563  ;;  %2717 = vst.msk [vmem:[%s4118_s10 + $0x50] sm:$0xff] %vm2706_vm3, %v2700_v40 }
 0x878   : > { %v2698_v48 = vsel %vm2689_vm2, %v2113_v39, %v3016_v42  ;;  %v3019_v58 = vadd.f32 -0.001, %v2666_v46  ;;  %v2664_v61 = vmul.f32 1.002, %v3564_v52 }
 0x879   : > { %v3566_v41 = vpop.eup %3565  ;;  %2715 = vst.msk [vmem:[%s4118_s10 + $0x40] sm:$0xff] %vm2706_vm3, %v2698_v48 }
 0x87a   : > { %v2701_v1 = vsel %vm2689_vm2, %v2116_v55, %v3019_v58  ;;  %v3017_v16 = vadd.f32 -0.001, %v2664_v61  ;;  %v2669_v2 = vmul.f32 1.002, %v3566_v41 }
 0x87b   : > { %v3568_v3 = vpop.eup %3567  ;;  %2718 = vst.msk [vmem:[%s4118_s10 + $0x58] sm:$0xff] %vm2706_vm3, %v2701_v1 }
 0x87c   : > { %v3570_v34 = vpop.eup %3569  ;;  %v2699_v44 = vsel %vm2689_vm2, %v2114_v19, %v3017_v16  ;;  %v3022_v6 = vadd.f32 -0.001, %v2669_v2  ;;  %v2667_v22 = vmul.f32 1.002, %v3568_v3 }
 0x87d   : > { %v3572_v7 = vpop.eup %3571  ;;  %2716 = vst.msk [vmem:[%s4118_s10 + $0x48] sm:$0xff] %vm2706_vm3, %v2699_v44  ;;  %v2120_v17 = vsub.f32 1.0, %v3570_v34 }
 0x87e   : > { %v3574_v10 = vpop.eup %3573  ;;  %v2704_v4 = vsel %vm2689_vm2, %v2119_v5, %v3022_v6  ;;  %v3020_v12 = vadd.f32 -0.001, %v2667_v22  ;;  %v2670_v63 = vmul.f32 1.002, %v3572_v7 }
 0x87f   : > { %v3576_v15 = vpop.eup %3575  ;;  %2721 = vst.msk [vmem:[%s4118_s10 + $0x70] sm:$0xff] %vm2706_vm3, %v2704_v4  ;;  %v2118_v21 = vsub.f32 1.0, %v3574_v10 }
 0x880   : > { %v2702_v53 = vsel %vm2689_vm2, %v2117_v11, %v3020_v12  ;;  %v3023_v47 = vadd.f32 -0.001, %v2670_v63  ;;  %v2668_v18 = vmul.f32 1.002, %v3576_v15 }
 0x881   : > { %2719 = vst.msk [vmem:[%s4118_s10 + $0x60] sm:$0xff] %vm2706_vm3, %v2702_v53 }
 0x882   : > { %v2705_v23 = vsel %vm2689_vm2, %v2120_v17, %v3023_v47  ;;  %v3021_v24 = vadd.f32 -0.001, %v2668_v18 }
 0x883   : > { %2722 = vst.msk [vmem:[%s4118_s10 + $0x78] sm:$0xff] %vm2706_vm3, %v2705_v23 }
 0x884   : > { %v2703_v50 = vsel %vm2689_vm2, %v2118_v21, %v3021_v24 }
 0x885   : > { %2720 = vst.msk [vmem:[%s4118_s10 + $0x68] sm:$0xff] %vm2706_vm3, %v2703_v50 }
 0x886 PF: > { %s16_s21 = sadd.s32 1, %s3599_s21  }
 0x887   : > { %p13_p4 = scmp.ge.s32.totalorder %s16_s21, 4  }
 0x889   :  { %15 = sbr.rel (!%p13_p4) target bundleno = 1 (0x1), region = 93 }

</bundles_post_ra>
